<compile_context>
chip_gen: v7x
topology: tpu7x:2x2x1
jax: 0.10.0
libtpu: 0.0.40
codegen_flags: <defaults>
</compile_context>

<pallas_src>
import functools

import jax
import jax.numpy as jnp
import numpy as np
from jax.experimental import pallas as pl
from jax.experimental.pallas import tpu as pltpu

K_SIZE = 3
BN_EPS = 1e-5
COMPUTE_DTYPE = jnp.bfloat16   # MXU operand dtype (f32 accumulation).
STORE_DTYPE = jnp.bfloat16     # inter-stage activation storage dtype.
VMEM_LIMIT = 32 * 1024 * 1024  # safe scoped-VMEM limit on v5e/v6e/v7x.


# ---------------------------------------------------------------------------
# In-kernel helpers
# ---------------------------------------------------------------------------
def _shift_lanes(x, d):
    """out[:, p] = x[:, p + d] if 0 <= p + d < N else 0 (zero fill, no wrap)."""
    if d == 0:
        return x
    c, n = x.shape
    z = jnp.zeros((c, abs(d)), dtype=x.dtype)
    if d > 0:
        return jnp.concatenate([x[:, d:], z], axis=1)
    return jnp.concatenate([z, x[:, : n + d]], axis=1)


def _conv3x3_taps(xc, w_ref, wmask_ref, *, W):
    """3x3 'same' conv of one image held in lane-dense (C_in, H*W) layout.

    xc        : (C_in, H*W) COMPUTE_DTYPE activation.
    w_ref     : (9, C_out, C_in) COMPUTE_DTYPE per-tap weights, k = kh*3 + kw.
    wmask_ref : (2, H*W) COMPUTE_DTYPE column masks (row 0: w-1 valid,
                row 1: w+1 valid).
    Returns (C_out, H*W) float32 conv output (accumulated over 9 MXU matmuls).
    """
    # Pre-shift + pre-mask once per horizontal offset dw; the column mask only
    # depends on w = p % W, which is invariant under the later row shift.
    u = {
        -1: _shift_lanes(xc, -1) * wmask_ref[0:1, :],
        0: xc,
        1: _shift_lanes(xc, 1) * wmask_ref[1:2, :],
    }
    acc = None
    for kh in range(K_SIZE):
        for kw in range(K_SIZE):
            win = _shift_lanes(u[kw - 1], (kh - 1) * W)      # (C_in, H*W)
            part = jnp.dot(w_ref[kh * K_SIZE + kw], win,
                           preferred_element_type=jnp.float32)
            acc = part if acc is None else acc + part
    return acc


def _conv_stage_body(act_fn, w_ref, wmask_ref, y_ref, stats_ref, *, W, B_t):
    """Shared body: conv over B_t images + per-channel sum / sum(y^2) stats."""
    @pl.when(pl.program_id(1) == 0)
    def _init():
        stats_ref[...] = jnp.zeros_like(stats_ref)

    c_out = w_ref.shape[1]
    total = jnp.zeros((c_out, 2), jnp.float32)
    for i in range(B_t):                       # static unroll over images
        xc = act_fn(i)                         # (C_in, H*W) COMPUTE_DTYPE
        acc = _conv3x3_taps(xc, w_ref, wmask_ref, W=W)       # (C_out, H*W) f32
        y_ref[i] = acc.astype(y_ref.dtype)
        s = jnp.sum(acc, axis=1, keepdims=True)
        ss = jnp.sum(acc * acc, axis=1, keepdims=True)
        total = total + jnp.concatenate([s, ss], axis=1)     # (C_out, 2)
    stats_ref[0] = stats_ref[0] + total


# ---------------------------------------------------------------------------
# Kernel bodies
# ---------------------------------------------------------------------------
def conv_stats_kernel(x_ref, w_ref, wmask_ref, y_ref, stats_ref, *, W, B_t):
    # Stage 1: conv1 on the raw input + BN1 batch statistics.
    def act(i):
        return x_ref[i].astype(COMPUTE_DTYPE)
    _conv_stage_body(act, w_ref, wmask_ref, y_ref, stats_ref, W=W, B_t=B_t)


def bn_relu_conv_stats_kernel(y1_ref, scale_ref, bias_ref, w_ref, wmask_ref,
                              y_ref, stats_ref, *, W, B_t):
    # Stage 2: BN1 apply + ReLU fused with conv2 + BN2 batch statistics.
    def act(i):
        a = jnp.maximum(
            y1_ref[i].astype(jnp.float32) * scale_ref[...] + bias_ref[...],
            0.0)
        return a.astype(COMPUTE_DTYPE)
    _conv_stage_body(act, w_ref, wmask_ref, y_ref, stats_ref, W=W, B_t=B_t)


def bn_relu_residual_kernel(y2_ref, x_ref, scale_ref, bias_ref, o_ref):
    # Stage 3: BN2 apply + ReLU + residual add, lane-dense (rows, H*W) layout.
    o_ref[...] = (
        jnp.maximum(
            y2_ref[...].astype(jnp.float32) * scale_ref[...] + bias_ref[...],
            0.0)
        + x_ref[...])


# ---------------------------------------------------------------------------
# Tiling heuristics
# ---------------------------------------------------------------------------
def _largest_divisor_leq(n, limit):
    limit = max(1, min(n, limit))
    for d in range(limit, 0, -1):
        if n % d == 0:
            return d
    return 1


def _pick_batch_tile(batch, per_image_bytes, budget=2 << 20, max_unroll=8):
    cap = max(1, min(max_unroll, budget // max(per_image_bytes, 1)))
    return _largest_divisor_leq(batch, cap)


def _pick_row_tile(n_rows, row_bytes, budget=4 << 20):
    max_rows = max(1, budget // max(row_bytes, 1))
    if n_rows <= max_rows:
        return n_rows
    best = 0
    t = 8
    while t <= max_rows:
        if n_rows % t == 0:
            best = t
        t += 8
    if best:
        return best
    # Pathological shape: no well-formed divisor under the budget.
    # TODO(synk): pad rows to a multiple of 8 instead of using the full extent.
    return n_rows


# ---------------------------------------------------------------------------
# pallas_call wrappers
# ---------------------------------------------------------------------------
def _conv_bn_stats_stage(kernel_fn, batched_input, channel_inputs, w9, wmask,
                         B, C, N, W, B_t, G):
    """One fused conv(+optional BN-apply) + statistics Pallas stage.

    batched_input : (B, C, N) activation array (f32 for stage 1, bf16 after).
    channel_inputs: per-channel (C, 1) f32 scale / bias arrays (stage 2 only).
    Returns (y (B, C, N) STORE_DTYPE, stats (C, 2) f32 = [sum, sum(y^2)]).
    """
    steps = B // B_t
    inner = steps // G

    batch_spec = pl.BlockSpec((B_t, C, N), lambda g, b: (g * inner + b, 0, 0))
    in_specs = [batch_spec]
    for a in channel_inputs:
        in_specs.append(pl.BlockSpec(a.shape, lambda g, b: (0, 0)))
    in_specs.append(pl.BlockSpec(w9.shape, lambda g, b: (0, 0, 0)))
    in_specs.append(pl.BlockSpec(wmask.shape, lambda g, b: (0, 0)))

    out_specs = [batch_spec,
                 pl.BlockSpec((1, C, 2), lambda g, b: (g, 0, 0))]
    out_shape = [jax.ShapeDtypeStruct((B, C, N), STORE_DTYPE),
                 jax.ShapeDtypeStruct((G, C, 2), jnp.float32)]

    flops = int(2 * B * N * (K_SIZE * K_SIZE) * C * C + 10 * B * N * C)
    bytes_accessed = int(
        B * C * N * (batched_input.dtype.itemsize
                     + jnp.dtype(STORE_DTYPE).itemsize)
        + int(np.prod(w9.shape)) * 2 + int(np.prod(wmask.shape)) * 2
        + G * C * 2 * 4
        + sum(int(np.prod(a.shape)) * 4 for a in channel_inputs))

    y, stats = pl.pallas_call(
        functools.partial(kernel_fn, W=W, B_t=B_t),
        grid_spec=pltpu.PrefetchScalarGridSpec(
            num_scalar_prefetch=0,
            grid=(G, inner),
            in_specs=in_specs,
            out_specs=out_specs,
        ),
        out_shape=out_shape,
        compiler_params=pltpu.CompilerParams(
            # Leading axis is batch-group parallel (v7x megacore); the inner
            # axis carries the resident per-group stats accumulator.
            dimension_semantics=("parallel", "arbitrary"),
            vmem_limit_bytes=VMEM_LIMIT),
        cost_estimate=pl.CostEstimate(flops=flops, transcendentals=0,
                                      bytes_accessed=bytes_accessed),
    )(batched_input, *channel_inputs, w9, wmask)
    return y, jnp.sum(stats, axis=0)


def _bn_relu_residual_stage(y2_rows, x_rows, scale_rows, bias_rows):
    n_rows, lane = y2_rows.shape
    row_bytes = lane * (y2_rows.dtype.itemsize + 4 + 4)
    tr = _pick_row_tile(n_rows, row_bytes)
    row_spec = pl.BlockSpec((tr, lane), lambda i: (i, 0))
    vec_spec = pl.BlockSpec((tr, 1), lambda i: (i, 0))
    flops = int(4 * n_rows * lane)
    bytes_accessed = int(n_rows * lane * (y2_rows.dtype.itemsize + 4 + 4)
                         + 2 * n_rows * 4)
    return pl.pallas_call(
        bn_relu_residual_kernel,
        grid_spec=pltpu.PrefetchScalarGridSpec(
            num_scalar_prefetch=0,
            grid=(n_rows // tr,),
            in_specs=[row_spec, row_spec, vec_spec, vec_spec],
            out_specs=row_spec,
        ),
        out_shape=jax.ShapeDtypeStruct((n_rows, lane), jnp.float32),
        compiler_params=pltpu.CompilerParams(
            dimension_semantics=("parallel",),
            vmem_limit_bytes=VMEM_LIMIT),
        cost_estimate=pl.CostEstimate(flops=flops, transcendentals=0,
                                      bytes_accessed=bytes_accessed),
    )(y2_rows, x_rows, scale_rows, bias_rows)


# ---------------------------------------------------------------------------
# Glue (layout transforms + tiny per-channel scalar math only)
# ---------------------------------------------------------------------------
def conv_weight_to_taps(w):
    """PyTorch conv weight (C_out, C_in, kh, kw) -> per-tap (9, C_out, C_in)."""
    c_out, c_in, kh, kw = w.shape
    return (jnp.transpose(w, (2, 3, 0, 1))
            .reshape(kh * kw, c_out, c_in)
            .astype(COMPUTE_DTYPE))


def _bn_scale_bias(stats, gamma, beta, count):
    """Fold train-mode BN (batch mean, biased var) into per-channel scale/bias."""
    mean = stats[:, 0] / count
    var = jnp.maximum(stats[:, 1] / count - mean * mean, 0.0)
    scale = gamma * jax.lax.rsqrt(var + BN_EPS)
    bias = beta - mean * scale
    return scale.reshape(-1, 1), bias.reshape(-1, 1)


def residual_forward(x_nchw, w1, g1, b1, w2, g2, b2):
    """Equivalent of Residual.forward (training-mode BN) on NCHW f32 input."""
    B, C, H, W = x_nchw.shape
    N = H * W
    M = B * N

    x3d = x_nchw.reshape(B, C, N)            # contiguous reshape: no HBM pass
    w1_9 = conv_weight_to_taps(w1)
    w2_9 = conv_weight_to_taps(w2)

    # Column-validity masks for the horizontal taps (0/1, exact in bf16).
    w_idx = jnp.arange(N, dtype=jnp.int32) % W
    wmask = jnp.stack([(w_idx >= 1).astype(COMPUTE_DTYPE),
                       (w_idx <= W - 2).astype(COMPUTE_DTYPE)], axis=0)

    per_image_bytes = C * N * (x3d.dtype.itemsize
                               + jnp.dtype(STORE_DTYPE).itemsize)
    B_t = _pick_batch_tile(B, per_image_bytes)
    steps = B // B_t
    G = 2 if steps % 2 == 0 else 1           # batch-group split for megacore

    # --- Stage 1: conv1 + BN1 statistics -------------------------------------
    y1, stats1 = _conv_bn_stats_stage(
        conv_stats_kernel, x3d, (), w1_9, wmask, B, C, N, W, B_t, G)
    scale1, bias1 = _bn_scale_bias(stats1, g1, b1, M)

    # --- Stage 2: BN1 apply + ReLU + conv2 + BN2 statistics -------------------
    y2, stats2 = _conv_bn_stats_stage(
        bn_relu_conv_stats_kernel, y1, (scale1, bias1), w2_9, wmask,
        B, C, N, W, B_t, G)
    scale2, bias2 = _bn_scale_bias(stats2, g2, b2, M)

    # --- Stage 3: BN2 apply + ReLU + residual add (lane-dense, NCHW output) ---
    out_rows = _bn_relu_residual_stage(
        y2.reshape(B * C, N),
        x3d.reshape(B * C, N),
        jnp.tile(scale2[:, 0], B).reshape(B * C, 1),
        jnp.tile(bias2[:, 0], B).reshape(B * C, 1))
    return out_rows.reshape(B, C, H, W)


# ---------------------------------------------------------------------------
# Pure-JAX reference (mirrors the bf16 MXU-operand / inter-stage storage casts)
# ---------------------------------------------------------------------------
def _conv3x3_ref(x_nchw_f32, w):
    B, C, H, W = x_nchw_f32.shape
    xc = x_nchw_f32.astype(COMPUTE_DTYPE)
    xp = jnp.pad(xc, ((0, 0), (0, 0), (1, 1), (1, 1)))
    wc = w.astype(COMPUTE_DTYPE)
    y = jnp.zeros((B, w.shape[0], H, W), jnp.float32)
    for kh in range(K_SIZE):
        for kw in range(K_SIZE):
            win = xp[:, :, kh:kh + H, kw:kw + W]
            y = y + jnp.einsum('oc,bchw->bohw', wc[:, :, kh, kw], win,
                               preferred_element_type=jnp.float32)
    return y


def _bn_relu_ref(y_f32, gamma, beta):
    mean = jnp.mean(y_f32, axis=(0, 2, 3))
    var = jnp.mean((y_f32 - mean.reshape(1, -1, 1, 1)) ** 2, axis=(0, 2, 3))
    scale = gamma * jax.lax.rsqrt(var + BN_EPS)
    bias = beta - mean * scale
    yq = y_f32.astype(STORE_DTYPE).astype(jnp.float32)  # mirror bf16 storage
    return jnp.maximum(
        yq * scale.reshape(1, -1, 1, 1) + bias.reshape(1, -1, 1, 1), 0.0)


def residual_reference(x, w1, g1, b1, w2, g2, b2):
    a1 = _bn_relu_ref(_conv3x3_ref(x, w1), g1, b1)
    a2 = _bn_relu_ref(_conv3x3_ref(a1, w2), g2, b2)
    return a2 + x


if __name__ == "__main__":
    B, C, H, W = 2, 4, 16, 16

    key = jax.random.PRNGKey(0)
    kx, kw1, kw2, kg1, kb1, kg2, kb2 = jax.random.split(key, 7)

    x = jax.random.normal(kx, (B, C, H, W), dtype=jnp.float32)
    # Conv2d(channels, channels, 3, padding=1, bias=False): (C_out, C_in, 3, 3)
    w1 = 0.1 * jax.random.normal(kw1, (C, C, K_SIZE, K_SIZE), dtype=jnp.float32)
    w2 = 0.1 * jax.random.normal(kw2, (C, C, K_SIZE, K_SIZE), dtype=jnp.float32)
    # BatchNorm2d affine params: (C,)
    g1 = 1.0 + 0.1 * jax.random.normal(kg1, (C,), dtype=jnp.float32)
    b1 = 0.1 * jax.random.normal(kb1, (C,), dtype=jnp.float32)
    g2 = 1.0 + 0.1 * jax.random.normal(kg2, (C,), dtype=jnp.float32)
    b2 = 0.1 * jax.random.normal(kb2, (C,), dtype=jnp.float32)

    out = jax.jit(residual_forward)(x, w1, g1, b1, w2, g2, b2)
    out = jax.block_until_ready(out)
    assert out.shape == (B, C, H, W), out.shape

    ref = np.asarray(residual_reference(x, w1, g1, b1, w2, g2, b2))
    got = np.asarray(out)
    # The reference applies the same bf16 operand / inter-stage storage casts
    # as the kernels; remaining differences are f32 accumulation order plus
    # rare one-ulp bf16 re-rounding of near-tie values.
    np.testing.assert_allclose(got, ref, atol=3e-2, rtol=3e-2)
    assert float(np.mean(np.abs(got - ref))) < 1e-3

    print("KERNEL_OK")
</pallas_src>

<mosaic_0001>
module attributes {stable_mosaic.version = 11 : i64} {
  func.func @conv_stats_kernel(%arg0: i32, %arg1: i32, %arg2: memref<2x4x256xf32, #tpu.memory_space<vmem>>, %arg3: memref<9x4x4xbf16, #tpu.memory_space<vmem>>, %arg4: memref<2x256xbf16, #tpu.memory_space<vmem>>, %arg5: memref<2x4x256xbf16, #tpu.memory_space<vmem>>, %arg6: memref<1x4x2xf32, #tpu.memory_space<vmem>>) attributes {dimension_semantics = [#tpu.dimension_semantics<parallel>, #tpu.dimension_semantics<arbitrary>], iteration_bounds = array<i64: 1, 1>, scalar_prefetch = 0 : i64, scratch_operands = 0 : i64, tpu.core_type = #tpu.core_type<tc>, window_params = [{transform_indices = @transform_0, window_bounds = array<i64: 2, 4, 256>}, {pipeline_mode = #tpu.pipeline_mode<synchronous>, transform_indices = @transform_1, window_bounds = array<i64: 9, 4, 4>}, {pipeline_mode = #tpu.pipeline_mode<synchronous>, transform_indices = @transform_2, window_bounds = array<i64: 2, 256>}, {transform_indices = @transform_3, window_bounds = array<i64: 2, 4, 256>}, {transform_indices = @transform_4, window_bounds = array<i64: 1, 4, 2>}]} {
    %c0_i32 = arith.constant 0 : i32
    %0 = arith.cmpi eq, %arg1, %c0_i32 : i32
    %1 = arith.extui %0 : i1 to i32
    %c0_i32_0 = arith.constant 0 : i32
    %2 = arith.cmpi ne, %1, %c0_i32_0 : i32
    scf.if %2 {
      %cst_110 = arith.constant 0.000000e+00 : f32
      %168 = vector.broadcast %cst_110 : f32 to vector<1x4x2xf32>
      %c0_111 = arith.constant 0 : index
      %c0_112 = arith.constant 0 : index
      %c0_113 = arith.constant 0 : index
      %169 = vector.load %arg6[%c0_111, %c0_112, %c0_113] : memref<1x4x2xf32, #tpu.memory_space<vmem>>, vector<1x4x2xf32>
      tpu.vector_store %arg6[%c0_111, %c0_112, %c0_113], %168 {strides = array<i32>} : memref<1x4x2xf32, #tpu.memory_space<vmem>>, vector<1x4x2xf32>,
    } else {
    }
    %cst = arith.constant 0.000000e+00 : f32
    %3 = vector.broadcast %cst : f32 to vector<4x2xf32>
    %c0 = arith.constant 0 : index
    %c0_1 = arith.constant 0 : index
    %c0_2 = arith.constant 0 : index
    %4 = vector.load %arg2[%c0, %c0_1, %c0_2] : memref<2x4x256xf32, #tpu.memory_space<vmem>>, vector<1x4x256xf32>
    %5 = vector.shape_cast %4 : vector<1x4x256xf32> to vector<4x256xf32>
    %6 = arith.truncf %5 : vector<4x256xf32> to vector<4x256xbf16>
    %cst_3 = arith.constant 0.000000e+00 : bf16
    %7 = vector.broadcast %cst_3 : bf16 to vector<4x1xbf16>
    %8 = vector.extract_strided_slice %6 {offsets = [0, 0], sizes = [4, 255], strides = [1, 1]} : vector<4x256xbf16> to vector<4x255xbf16>
    %9 = tpu.concatenate %7, %8 in 1 : vector<4x1xbf16>, vector<4x255xbf16> -> vector<4x256xbf16>
    %c0_4 = arith.constant 0 : index
    %c0_5 = arith.constant 0 : index
    %10 = vector.load %arg4[%c0_4, %c0_5] : memref<2x256xbf16, #tpu.memory_space<vmem>>, vector<1x256xbf16>
    %11 = vector.broadcast %10 : vector<1x256xbf16> to vector<4x256xbf16>
    %12 = arith.mulf %9, %11 : vector<4x256xbf16>
    %cst_6 = arith.constant 0.000000e+00 : bf16
    %13 = vector.broadcast %cst_6 : bf16 to vector<4x1xbf16>
    %14 = vector.extract_strided_slice %6 {offsets = [0, 1], sizes = [4, 255], strides = [1, 1]} : vector<4x256xbf16> to vector<4x255xbf16>
    %15 = tpu.concatenate %14, %13 in 1 : vector<4x255xbf16>, vector<4x1xbf16> -> vector<4x256xbf16>
    %c1 = arith.constant 1 : index
    %c0_7 = arith.constant 0 : index
    %16 = vector.load %arg4[%c1, %c0_7] : memref<2x256xbf16, #tpu.memory_space<vmem>>, vector<1x256xbf16>
    %17 = vector.broadcast %16 : vector<1x256xbf16> to vector<4x256xbf16>
    %18 = arith.mulf %15, %17 : vector<4x256xbf16>
    %cst_8 = arith.constant 0.000000e+00 : bf16
    %19 = vector.broadcast %cst_8 : bf16 to vector<4x16xbf16>
    %20 = vector.extract_strided_slice %12 {offsets = [0, 0], sizes = [4, 240], strides = [1, 1]} : vector<4x256xbf16> to vector<4x240xbf16>
    %21 = tpu.concatenate %19, %20 in 1 : vector<4x16xbf16>, vector<4x240xbf16> -> vector<4x256xbf16>
    %c0_9 = arith.constant 0 : index
    %c0_10 = arith.constant 0 : index
    %c0_11 = arith.constant 0 : index
    %22 = vector.load %arg3[%c0_9, %c0_10, %c0_11] : memref<9x4x4xbf16, #tpu.memory_space<vmem>>, vector<1x4x4xbf16>
    %23 = vector.shape_cast %22 : vector<1x4x4xbf16> to vector<4x4xbf16>
    %cst_12 = arith.constant dense<0.000000e+00> : vector<4x256xf32>
    %24 = tpu.matmul %23, %21, %cst_12 {dimension_numbers = #tpu.dot_dimension_numbers<[1], [0], [0], [1], [0, 0, 1, 1], [], []>} : vector<4x4xbf16>, vector<4x256xbf16>, vector<4x256xf32> -> vector<4x256xf32>
    %cst_13 = arith.constant 0.000000e+00 : bf16
    %25 = vector.broadcast %cst_13 : bf16 to vector<4x16xbf16>
    %26 = vector.extract_strided_slice %6 {offsets = [0, 0], sizes = [4, 240], strides = [1, 1]} : vector<4x256xbf16> to vector<4x240xbf16>
    %27 = tpu.concatenate %25, %26 in 1 : vector<4x16xbf16>, vector<4x240xbf16> -> vector<4x256xbf16>
    %c1_14 = arith.constant 1 : index
    %c0_15 = arith.constant 0 : index
    %c0_16 = arith.constant 0 : index
    %28 = vector.load %arg3[%c1_14, %c0_15, %c0_16] : memref<9x4x4xbf16, #tpu.memory_space<vmem>>, vector<1x4x4xbf16>
    %29 = vector.shape_cast %28 : vector<1x4x4xbf16> to vector<4x4xbf16>
    %cst_17 = arith.constant dense<0.000000e+00> : vector<4x256xf32>
    %30 = tpu.matmul %29, %27, %cst_17 {dimension_numbers = #tpu.dot_dimension_numbers<[1], [0], [0], [1], [0, 0, 1, 1], [], []>} : vector<4x4xbf16>, vector<4x256xbf16>, vector<4x256xf32> -> vector<4x256xf32>
    %31 = arith.addf %24, %30 : vector<4x256xf32>
    %cst_18 = arith.constant 0.000000e+00 : bf16
    %32 = vector.broadcast %cst_18 : bf16 to vector<4x16xbf16>
    %33 = vector.extract_strided_slice %18 {offsets = [0, 0], sizes = [4, 240], strides = [1, 1]} : vector<4x256xbf16> to vector<4x240xbf16>
    %34 = tpu.concatenate %32, %33 in 1 : vector<4x16xbf16>, vector<4x240xbf16> -> vector<4x256xbf16>
    %c2 = arith.constant 2 : index
    %c0_19 = arith.constant 0 : index
    %c0_20 = arith.constant 0 : index
    %35 = vector.load %arg3[%c2, %c0_19, %c0_20] : memref<9x4x4xbf16, #tpu.memory_space<vmem>>, vector<1x4x4xbf16>
    %36 = vector.shape_cast %35 : vector<1x4x4xbf16> to vector<4x4xbf16>
    %cst_21 = arith.constant dense<0.000000e+00> : vector<4x256xf32>
    %37 = tpu.matmul %36, %34, %cst_21 {dimension_numbers = #tpu.dot_dimension_numbers<[1], [0], [0], [1], [0, 0, 1, 1], [], []>} : vector<4x4xbf16>, vector<4x256xbf16>, vector<4x256xf32> -> vector<4x256xf32>
    %38 = arith.addf %31, %37 : vector<4x256xf32>
    %c3 = arith.constant 3 : index
    %c0_22 = arith.constant 0 : index
    %c0_23 = arith.constant 0 : index
    %39 = vector.load %arg3[%c3, %c0_22, %c0_23] : memref<9x4x4xbf16, #tpu.memory_space<vmem>>, vector<1x4x4xbf16>
    %40 = vector.shape_cast %39 : vector<1x4x4xbf16> to vector<4x4xbf16>
    %cst_24 = arith.constant dense<0.000000e+00> : vector<4x256xf32>
    %41 = tpu.matmul %40, %12, %cst_24 {dimension_numbers = #tpu.dot_dimension_numbers<[1], [0], [0], [1], [0, 0, 1, 1], [], []>} : vector<4x4xbf16>, vector<4x256xbf16>, vector<4x256xf32> -> vector<4x256xf32>
    %42 = arith.addf %38, %41 : vector<4x256xf32>
    %c4 = arith.constant 4 : index
    %c0_25 = arith.constant 0 : index
    %c0_26 = arith.constant 0 : index
    %43 = vector.load %arg3[%c4, %c0_25, %c0_26] : memref<9x4x4xbf16, #tpu.memory_space<vmem>>, vector<1x4x4xbf16>
    %44 = vector.shape_cast %43 : vector<1x4x4xbf16> to vector<4x4xbf16>
    %cst_27 = arith.constant dense<0.000000e+00> : vector<4x256xf32>
    %45 = tpu.matmul %44, %6, %cst_27 {dimension_numbers = #tpu.dot_dimension_numbers<[1], [0], [0], [1], [0, 0, 1, 1], [], []>} : vector<4x4xbf16>, vector<4x256xbf16>, vector<4x256xf32> -> vector<4x256xf32>
    %46 = arith.addf %42, %45 : vector<4x256xf32>
    %c5 = arith.constant 5 : index
    %c0_28 = arith.constant 0 : index
    %c0_29 = arith.constant 0 : index
    %47 = vector.load %arg3[%c5, %c0_28, %c0_29] : memref<9x4x4xbf16, #tpu.memory_space<vmem>>, vector<1x4x4xbf16>
    %48 = vector.shape_cast %47 : vector<1x4x4xbf16> to vector<4x4xbf16>
    %cst_30 = arith.constant dense<0.000000e+00> : vector<4x256xf32>
    %49 = tpu.matmul %48, %18, %cst_30 {dimension_numbers = #tpu.dot_dimension_numbers<[1], [0], [0], [1], [0, 0, 1, 1], [], []>} : vector<4x4xbf16>, vector<4x256xbf16>, vector<4x256xf32> -> vector<4x256xf32>
    %50 = arith.addf %46, %49 : vector<4x256xf32>
    %cst_31 = arith.constant 0.000000e+00 : bf16
    %51 = vector.broadcast %cst_31 : bf16 to vector<4x16xbf16>
    %52 = vector.extract_strided_slice %12 {offsets = [0, 16], sizes = [4, 240], strides = [1, 1]} : vector<4x256xbf16> to vector<4x240xbf16>
    %53 = tpu.concatenate %52, %51 in 1 : vector<4x240xbf16>, vector<4x16xbf16> -> vector<4x256xbf16>
    %c6 = arith.constant 6 : index
    %c0_32 = arith.constant 0 : index
    %c0_33 = arith.constant 0 : index
    %54 = vector.load %arg3[%c6, %c0_32, %c0_33] : memref<9x4x4xbf16, #tpu.memory_space<vmem>>, vector<1x4x4xbf16>
    %55 = vector.shape_cast %54 : vector<1x4x4xbf16> to vector<4x4xbf16>
    %cst_34 = arith.constant dense<0.000000e+00> : vector<4x256xf32>
    %56 = tpu.matmul %55, %53, %cst_34 {dimension_numbers = #tpu.dot_dimension_numbers<[1], [0], [0], [1], [0, 0, 1, 1], [], []>} : vector<4x4xbf16>, vector<4x256xbf16>, vector<4x256xf32> -> vector<4x256xf32>
    %57 = arith.addf %50, %56 : vector<4x256xf32>
    %cst_35 = arith.constant 0.000000e+00 : bf16
    %58 = vector.broadcast %cst_35 : bf16 to vector<4x16xbf16>
    %59 = vector.extract_strided_slice %6 {offsets = [0, 16], sizes = [4, 240], strides = [1, 1]} : vector<4x256xbf16> to vector<4x240xbf16>
    %60 = tpu.concatenate %59, %58 in 1 : vector<4x240xbf16>, vector<4x16xbf16> -> vector<4x256xbf16>
    %c7 = arith.constant 7 : index
    %c0_36 = arith.constant 0 : index
    %c0_37 = arith.constant 0 : index
    %61 = vector.load %arg3[%c7, %c0_36, %c0_37] : memref<9x4x4xbf16, #tpu.memory_space<vmem>>, vector<1x4x4xbf16>
    %62 = vector.shape_cast %61 : vector<1x4x4xbf16> to vector<4x4xbf16>
    %cst_38 = arith.constant dense<0.000000e+00> : vector<4x256xf32>
    %63 = tpu.matmul %62, %60, %cst_38 {dimension_numbers = #tpu.dot_dimension_numbers<[1], [0], [0], [1], [0, 0, 1, 1], [], []>} : vector<4x4xbf16>, vector<4x256xbf16>, vector<4x256xf32> -> vector<4x256xf32>
    %64 = arith.addf %57, %63 : vector<4x256xf32>
    %cst_39 = arith.constant 0.000000e+00 : bf16
    %65 = vector.broadcast %cst_39 : bf16 to vector<4x16xbf16>
    %66 = vector.extract_strided_slice %18 {offsets = [0, 16], sizes = [4, 240], strides = [1, 1]} : vector<4x256xbf16> to vector<4x240xbf16>
    %67 = tpu.concatenate %66, %65 in 1 : vector<4x240xbf16>, vector<4x16xbf16> -> vector<4x256xbf16>
    %c8 = arith.constant 8 : index
    %c0_40 = arith.constant 0 : index
    %c0_41 = arith.constant 0 : index
    %68 = vector.load %arg3[%c8, %c0_40, %c0_41] : memref<9x4x4xbf16, #tpu.memory_space<vmem>>, vector<1x4x4xbf16>
    %69 = vector.shape_cast %68 : vector<1x4x4xbf16> to vector<4x4xbf16>
    %cst_42 = arith.constant dense<0.000000e+00> : vector<4x256xf32>
    %70 = tpu.matmul %69, %67, %cst_42 {dimension_numbers = #tpu.dot_dimension_numbers<[1], [0], [0], [1], [0, 0, 1, 1], [], []>} : vector<4x4xbf16>, vector<4x256xbf16>, vector<4x256xf32> -> vector<4x256xf32>
    %71 = arith.addf %64, %70 : vector<4x256xf32>
    %72 = arith.truncf %71 : vector<4x256xf32> to vector<4x256xbf16>
    %c0_43 = arith.constant 0 : index
    %c0_44 = arith.constant 0 : index
    %c0_45 = arith.constant 0 : index
    %73 = vector.load %arg5[%c0_43, %c0_44, %c0_45] : memref<2x4x256xbf16, #tpu.memory_space<vmem>>, vector<1x4x256xbf16>
    %74 = vector.shape_cast %73 : vector<1x4x256xbf16> to vector<4x256xbf16>
    %75 = vector.shape_cast %72 : vector<4x256xbf16> to vector<1x4x256xbf16>
    tpu.vector_store %arg5[%c0_43, %c0_44, %c0_45], %75 {strides = array<i32>} : memref<2x4x256xbf16, #tpu.memory_space<vmem>>, vector<1x4x256xbf16>,
    %cst_46 = arith.constant dense<0.000000e+00> : vector<4xf32>
    %76 = vector.multi_reduction <add>, %71, %cst_46 [1] : vector<4x256xf32> to vector<4xf32>
    %77 = vector.shape_cast %76 : vector<4xf32> to vector<4x1xf32>
    %78 = arith.mulf %71, %71 : vector<4x256xf32>
    %cst_47 = arith.constant dense<0.000000e+00> : vector<4xf32>
    %79 = vector.multi_reduction <add>, %78, %cst_47 [1] : vector<4x256xf32> to vector<4xf32>
    %80 = vector.shape_cast %79 : vector<4xf32> to vector<4x1xf32>
    %81 = tpu.concatenate %77, %80 in 1 : vector<4x1xf32>, vector<4x1xf32> -> vector<4x2xf32>
    %82 = arith.addf %3, %81 : vector<4x2xf32>
    %c1_48 = arith.constant 1 : index
    %c0_49 = arith.constant 0 : index
    %c0_50 = arith.constant 0 : index
    %83 = vector.load %arg2[%c1_48, %c0_49, %c0_50] : memref<2x4x256xf32, #tpu.memory_space<vmem>>, vector<1x4x256xf32>
    %84 = vector.shape_cast %83 : vector<1x4x256xf32> to vector<4x256xf32>
    %85 = arith.truncf %84 : vector<4x256xf32> to vector<4x256xbf16>
    %cst_51 = arith.constant 0.000000e+00 : bf16
    %86 = vector.broadcast %cst_51 : bf16 to vector<4x1xbf16>
    %87 = vector.extract_strided_slice %85 {offsets = [0, 0], sizes = [4, 255], strides = [1, 1]} : vector<4x256xbf16> to vector<4x255xbf16>
    %88 = tpu.concatenate %86, %87 in 1 : vector<4x1xbf16>, vector<4x255xbf16> -> vector<4x256xbf16>
    %c0_52 = arith.constant 0 : index
    %c0_53 = arith.constant 0 : index
    %89 = vector.load %arg4[%c0_52, %c0_53] : memref<2x256xbf16, #tpu.memory_space<vmem>>, vector<1x256xbf16>
    %90 = vector.broadcast %89 : vector<1x256xbf16> to vector<4x256xbf16>
    %91 = arith.mulf %88, %90 : vector<4x256xbf16>
    %cst_54 = arith.constant 0.000000e+00 : bf16
    %92 = vector.broadcast %cst_54 : bf16 to vector<4x1xbf16>
    %93 = vector.extract_strided_slice %85 {offsets = [0, 1], sizes = [4, 255], strides = [1, 1]} : vector<4x256xbf16> to vector<4x255xbf16>
    %94 = tpu.concatenate %93, %92 in 1 : vector<4x255xbf16>, vector<4x1xbf16> -> vector<4x256xbf16>
    %c1_55 = arith.constant 1 : index
    %c0_56 = arith.constant 0 : index
    %95 = vector.load %arg4[%c1_55, %c0_56] : memref<2x256xbf16, #tpu.memory_space<vmem>>, vector<1x256xbf16>
    %96 = vector.broadcast %95 : vector<1x256xbf16> to vector<4x256xbf16>
    %97 = arith.mulf %94, %96 : vector<4x256xbf16>
    %cst_57 = arith.constant 0.000000e+00 : bf16
    %98 = vector.broadcast %cst_57 : bf16 to vector<4x16xbf16>
    %99 = vector.extract_strided_slice %91 {offsets = [0, 0], sizes = [4, 240], strides = [1, 1]} : vector<4x256xbf16> to vector<4x240xbf16>
    %100 = tpu.concatenate %98, %99 in 1 : vector<4x16xbf16>, vector<4x240xbf16> -> vector<4x256xbf16>
    %c0_58 = arith.constant 0 : index
    %c0_59 = arith.constant 0 : index
    %c0_60 = arith.constant 0 : index
    %101 = vector.load %arg3[%c0_58, %c0_59, %c0_60] : memref<9x4x4xbf16, #tpu.memory_space<vmem>>, vector<1x4x4xbf16>
    %102 = vector.shape_cast %101 : vector<1x4x4xbf16> to vector<4x4xbf16>
    %cst_61 = arith.constant dense<0.000000e+00> : vector<4x256xf32>
    %103 = tpu.matmul %102, %100, %cst_61 {dimension_numbers = #tpu.dot_dimension_numbers<[1], [0], [0], [1], [0, 0, 1, 1], [], []>} : vector<4x4xbf16>, vector<4x256xbf16>, vector<4x256xf32> -> vector<4x256xf32>
    %cst_62 = arith.constant 0.000000e+00 : bf16
    %104 = vector.broadcast %cst_62 : bf16 to vector<4x16xbf16>
    %105 = vector.extract_strided_slice %85 {offsets = [0, 0], sizes = [4, 240], strides = [1, 1]} : vector<4x256xbf16> to vector<4x240xbf16>
    %106 = tpu.concatenate %104, %105 in 1 : vector<4x16xbf16>, vector<4x240xbf16> -> vector<4x256xbf16>
    %c1_63 = arith.constant 1 : index
    %c0_64 = arith.constant 0 : index
    %c0_65 = arith.constant 0 : index
    %107 = vector.load %arg3[%c1_63, %c0_64, %c0_65] : memref<9x4x4xbf16, #tpu.memory_space<vmem>>, vector<1x4x4xbf16>
    %108 = vector.shape_cast %107 : vector<1x4x4xbf16> to vector<4x4xbf16>
    %cst_66 = arith.constant dense<0.000000e+00> : vector<4x256xf32>
    %109 = tpu.matmul %108, %106, %cst_66 {dimension_numbers = #tpu.dot_dimension_numbers<[1], [0], [0], [1], [0, 0, 1, 1], [], []>} : vector<4x4xbf16>, vector<4x256xbf16>, vector<4x256xf32> -> vector<4x256xf32>
    %110 = arith.addf %103, %109 : vector<4x256xf32>
    %cst_67 = arith.constant 0.000000e+00 : bf16
    %111 = vector.broadcast %cst_67 : bf16 to vector<4x16xbf16>
    %112 = vector.extract_strided_slice %97 {offsets = [0, 0], sizes = [4, 240], strides = [1, 1]} : vector<4x256xbf16> to vector<4x240xbf16>
    %113 = tpu.concatenate %111, %112 in 1 : vector<4x16xbf16>, vector<4x240xbf16> -> vector<4x256xbf16>
    %c2_68 = arith.constant 2 : index
    %c0_69 = arith.constant 0 : index
    %c0_70 = arith.constant 0 : index
    %114 = vector.load %arg3[%c2_68, %c0_69, %c0_70] : memref<9x4x4xbf16, #tpu.memory_space<vmem>>, vector<1x4x4xbf16>
    %115 = vector.shape_cast %114 : vector<1x4x4xbf16> to vector<4x4xbf16>
    %cst_71 = arith.constant dense<0.000000e+00> : vector<4x256xf32>
    %116 = tpu.matmul %115, %113, %cst_71 {dimension_numbers = #tpu.dot_dimension_numbers<[1], [0], [0], [1], [0, 0, 1, 1], [], []>} : vector<4x4xbf16>, vector<4x256xbf16>, vector<4x256xf32> -> vector<4x256xf32>
    %117 = arith.addf %110, %116 : vector<4x256xf32>
    %c3_72 = arith.constant 3 : index
    %c0_73 = arith.constant 0 : index
    %c0_74 = arith.constant 0 : index
    %118 = vector.load %arg3[%c3_72, %c0_73, %c0_74] : memref<9x4x4xbf16, #tpu.memory_space<vmem>>, vector<1x4x4xbf16>
    %119 = vector.shape_cast %118 : vector<1x4x4xbf16> to vector<4x4xbf16>
    %cst_75 = arith.constant dense<0.000000e+00> : vector<4x256xf32>
    %120 = tpu.matmul %119, %91, %cst_75 {dimension_numbers = #tpu.dot_dimension_numbers<[1], [0], [0], [1], [0, 0, 1, 1], [], []>} : vector<4x4xbf16>, vector<4x256xbf16>, vector<4x256xf32> -> vector<4x256xf32>
    %121 = arith.addf %117, %120 : vector<4x256xf32>
    %c4_76 = arith.constant 4 : index
    %c0_77 = arith.constant 0 : index
    %c0_78 = arith.constant 0 : index
    %122 = vector.load %arg3[%c4_76, %c0_77, %c0_78] : memref<9x4x4xbf16, #tpu.memory_space<vmem>>, vector<1x4x4xbf16>
    %123 = vector.shape_cast %122 : vector<1x4x4xbf16> to vector<4x4xbf16>
    %cst_79 = arith.constant dense<0.000000e+00> : vector<4x256xf32>
    %124 = tpu.matmul %123, %85, %cst_79 {dimension_numbers = #tpu.dot_dimension_numbers<[1], [0], [0], [1], [0, 0, 1, 1], [], []>} : vector<4x4xbf16>, vector<4x256xbf16>, vector<4x256xf32> -> vector<4x256xf32>
    %125 = arith.addf %121, %124 : vector<4x256xf32>
    %c5_80 = arith.constant 5 : index
    %c0_81 = arith.constant 0 : index
    %c0_82 = arith.constant 0 : index
    %126 = vector.load %arg3[%c5_80, %c0_81, %c0_82] : memref<9x4x4xbf16, #tpu.memory_space<vmem>>, vector<1x4x4xbf16>
    %127 = vector.shape_cast %126 : vector<1x4x4xbf16> to vector<4x4xbf16>
    %cst_83 = arith.constant dense<0.000000e+00> : vector<4x256xf32>
    %128 = tpu.matmul %127, %97, %cst_83 {dimension_numbers = #tpu.dot_dimension_numbers<[1], [0], [0], [1], [0, 0, 1, 1], [], []>} : vector<4x4xbf16>, vector<4x256xbf16>, vector<4x256xf32> -> vector<4x256xf32>
    %129 = arith.addf %125, %128 : vector<4x256xf32>
    %cst_84 = arith.constant 0.000000e+00 : bf16
    %130 = vector.broadcast %cst_84 : bf16 to vector<4x16xbf16>
    %131 = vector.extract_strided_slice %91 {offsets = [0, 16], sizes = [4, 240], strides = [1, 1]} : vector<4x256xbf16> to vector<4x240xbf16>
    %132 = tpu.concatenate %131, %130 in 1 : vector<4x240xbf16>, vector<4x16xbf16> -> vector<4x256xbf16>
    %c6_85 = arith.constant 6 : index
    %c0_86 = arith.constant 0 : index
    %c0_87 = arith.constant 0 : index
    %133 = vector.load %arg3[%c6_85, %c0_86, %c0_87] : memref<9x4x4xbf16, #tpu.memory_space<vmem>>, vector<1x4x4xbf16>
    %134 = vector.shape_cast %133 : vector<1x4x4xbf16> to vector<4x4xbf16>
    %cst_88 = arith.constant dense<0.000000e+00> : vector<4x256xf32>
    %135 = tpu.matmul %134, %132, %cst_88 {dimension_numbers = #tpu.dot_dimension_numbers<[1], [0], [0], [1], [0, 0, 1, 1], [], []>} : vector<4x4xbf16>, vector<4x256xbf16>, vector<4x256xf32> -> vector<4x256xf32>
    %136 = arith.addf %129, %135 : vector<4x256xf32>
    %cst_89 = arith.constant 0.000000e+00 : bf16
    %137 = vector.broadcast %cst_89 : bf16 to vector<4x16xbf16>
    %138 = vector.extract_strided_slice %85 {offsets = [0, 16], sizes = [4, 240], strides = [1, 1]} : vector<4x256xbf16> to vector<4x240xbf16>
    %139 = tpu.concatenate %138, %137 in 1 : vector<4x240xbf16>, vector<4x16xbf16> -> vector<4x256xbf16>
    %c7_90 = arith.constant 7 : index
    %c0_91 = arith.constant 0 : index
    %c0_92 = arith.constant 0 : index
    %140 = vector.load %arg3[%c7_90, %c0_91, %c0_92] : memref<9x4x4xbf16, #tpu.memory_space<vmem>>, vector<1x4x4xbf16>
    %141 = vector.shape_cast %140 : vector<1x4x4xbf16> to vector<4x4xbf16>
    %cst_93 = arith.constant dense<0.000000e+00> : vector<4x256xf32>
    %142 = tpu.matmul %141, %139, %cst_93 {dimension_numbers = #tpu.dot_dimension_numbers<[1], [0], [0], [1], [0, 0, 1, 1], [], []>} : vector<4x4xbf16>, vector<4x256xbf16>, vector<4x256xf32> -> vector<4x256xf32>
    %143 = arith.addf %136, %142 : vector<4x256xf32>
    %cst_94 = arith.constant 0.000000e+00 : bf16
    %144 = vector.broadcast %cst_94 : bf16 to vector<4x16xbf16>
    %145 = vector.extract_strided_slice %97 {offsets = [0, 16], sizes = [4, 240], strides = [1, 1]} : vector<4x256xbf16> to vector<4x240xbf16>
    %146 = tpu.concatenate %145, %144 in 1 : vector<4x240xbf16>, vector<4x16xbf16> -> vector<4x256xbf16>
    %c8_95 = arith.constant 8 : index
    %c0_96 = arith.constant 0 : index
    %c0_97 = arith.constant 0 : index
    %147 = vector.load %arg3[%c8_95, %c0_96, %c0_97] : memref<9x4x4xbf16, #tpu.memory_space<vmem>>, vector<1x4x4xbf16>
    %148 = vector.shape_cast %147 : vector<1x4x4xbf16> to vector<4x4xbf16>
    %cst_98 = arith.constant dense<0.000000e+00> : vector<4x256xf32>
    %149 = tpu.matmul %148, %146, %cst_98 {dimension_numbers = #tpu.dot_dimension_numbers<[1], [0], [0], [1], [0, 0, 1, 1], [], []>} : vector<4x4xbf16>, vector<4x256xbf16>, vector<4x256xf32> -> vector<4x256xf32>
    %150 = arith.addf %143, %149 : vector<4x256xf32>
    %151 = arith.truncf %150 : vector<4x256xf32> to vector<4x256xbf16>
    %c1_99 = arith.constant 1 : index
    %c0_100 = arith.constant 0 : index
    %c0_101 = arith.constant 0 : index
    %152 = vector.load %arg5[%c1_99, %c0_100, %c0_101] : memref<2x4x256xbf16, #tpu.memory_space<vmem>>, vector<1x4x256xbf16>
    %153 = vector.shape_cast %152 : vector<1x4x256xbf16> to vector<4x256xbf16>
    %154 = vector.shape_cast %151 : vector<4x256xbf16> to vector<1x4x256xbf16>
    tpu.vector_store %arg5[%c1_99, %c0_100, %c0_101], %154 {strides = array<i32>} : memref<2x4x256xbf16, #tpu.memory_space<vmem>>, vector<1x4x256xbf16>,
    %cst_102 = arith.constant dense<0.000000e+00> : vector<4xf32>
    %155 = vector.multi_reduction <add>, %150, %cst_102 [1] : vector<4x256xf32> to vector<4xf32>
    %156 = vector.shape_cast %155 : vector<4xf32> to vector<4x1xf32>
    %157 = arith.mulf %150, %150 : vector<4x256xf32>
    %cst_103 = arith.constant dense<0.000000e+00> : vector<4xf32>
    %158 = vector.multi_reduction <add>, %157, %cst_103 [1] : vector<4x256xf32> to vector<4xf32>
    %159 = vector.shape_cast %158 : vector<4xf32> to vector<4x1xf32>
    %160 = tpu.concatenate %156, %159 in 1 : vector<4x1xf32>, vector<4x1xf32> -> vector<4x2xf32>
    %161 = arith.addf %82, %160 : vector<4x2xf32>
    %c0_104 = arith.constant 0 : index
    %c0_105 = arith.constant 0 : index
    %c0_106 = arith.constant 0 : index
    %162 = vector.load %arg6[%c0_104, %c0_105, %c0_106] : memref<1x4x2xf32, #tpu.memory_space<vmem>>, vector<1x4x2xf32>
    %163 = vector.shape_cast %162 : vector<1x4x2xf32> to vector<4x2xf32>
    %164 = arith.addf %163, %161 : vector<4x2xf32>
    %c0_107 = arith.constant 0 : index
    %c0_108 = arith.constant 0 : index
    %c0_109 = arith.constant 0 : index
    %165 = vector.load %arg6[%c0_107, %c0_108, %c0_109] : memref<1x4x2xf32, #tpu.memory_space<vmem>>, vector<1x4x2xf32>
    %166 = vector.shape_cast %165 : vector<1x4x2xf32> to vector<4x2xf32>
    %167 = vector.shape_cast %164 : vector<4x2xf32> to vector<1x4x2xf32>
    tpu.vector_store %arg6[%c0_107, %c0_108, %c0_109], %167 {strides = array<i32>} : memref<1x4x2xf32, #tpu.memory_space<vmem>>, vector<1x4x2xf32>,
    return
  }
  func.func @transform_0(%arg0: i32, %arg1: i32) -> (i32, i32, i32) {
    %c1_i32 = arith.constant 1 : i32
    %0 = arith.muli %arg0, %c1_i32 : i32
    %1 = arith.addi %0, %arg1 : i32
    %c0_i32 = arith.constant 0 : i32
    %c0_i32_0 = arith.constant 0 : i32
    %c0_i32_1 = arith.constant 0 : i32
    return %1, %c0_i32, %c0_i32_0 : i32, i32, i32
  }
  func.func @transform_1(%arg0: i32, %arg1: i32) -> (i32, i32, i32) {
    %c0_i32 = arith.constant 0 : i32
    %c0_i32_0 = arith.constant 0 : i32
    %c0_i32_1 = arith.constant 0 : i32
    %c0_i32_2 = arith.constant 0 : i32
    return %c0_i32, %c0_i32_0, %c0_i32_1 : i32, i32, i32
  }
  func.func @transform_2(%arg0: i32, %arg1: i32) -> (i32, i32) {
    %c0_i32 = arith.constant 0 : i32
    %c0_i32_0 = arith.constant 0 : i32
    %c0_i32_1 = arith.constant 0 : i32
    return %c0_i32, %c0_i32_0 : i32, i32
  }
  func.func @transform_3(%arg0: i32, %arg1: i32) -> (i32, i32, i32) {
    %c1_i32 = arith.constant 1 : i32
    %0 = arith.muli %arg0, %c1_i32 : i32
    %1 = arith.addi %0, %arg1 : i32
    %c0_i32 = arith.constant 0 : i32
    %c0_i32_0 = arith.constant 0 : i32
    %c0_i32_1 = arith.constant 0 : i32
    return %1, %c0_i32, %c0_i32_0 : i32, i32, i32
  }
  func.func @transform_4(%arg0: i32, %arg1: i32) -> (i32, i32, i32) {
    %c0_i32 = arith.constant 0 : i32
    %c0_i32_0 = arith.constant 0 : i32
    %c0_i32_1 = arith.constant 0 : i32
    return %arg0, %c0_i32, %c0_i32_0 : i32, i32, i32
  }
}

module attributes {stable_mosaic.version = 11 : i64} {
  func.func @bn_relu_conv_stats_kernel(%arg0: i32, %arg1: i32, %arg2: memref<2x4x256xbf16, #tpu.memory_space<vmem>>, %arg3: memref<4x1xf32, #tpu.memory_space<vmem>>, %arg4: memref<4x1xf32, #tpu.memory_space<vmem>>, %arg5: memref<9x4x4xbf16, #tpu.memory_space<vmem>>, %arg6: memref<2x256xbf16, #tpu.memory_space<vmem>>, %arg7: memref<2x4x256xbf16, #tpu.memory_space<vmem>>, %arg8: memref<1x4x2xf32, #tpu.memory_space<vmem>>) attributes {dimension_semantics = [#tpu.dimension_semantics<parallel>, #tpu.dimension_semantics<arbitrary>], iteration_bounds = array<i64: 1, 1>, scalar_prefetch = 0 : i64, scratch_operands = 0 : i64, tpu.core_type = #tpu.core_type<tc>, window_params = [{transform_indices = @transform_0, window_bounds = array<i64: 2, 4, 256>}, {pipeline_mode = #tpu.pipeline_mode<synchronous>, transform_indices = @transform_1, window_bounds = array<i64: 4, 1>}, {pipeline_mode = #tpu.pipeline_mode<synchronous>, transform_indices = @transform_2, window_bounds = array<i64: 4, 1>}, {pipeline_mode = #tpu.pipeline_mode<synchronous>, transform_indices = @transform_3, window_bounds = array<i64: 9, 4, 4>}, {pipeline_mode = #tpu.pipeline_mode<synchronous>, transform_indices = @transform_4, window_bounds = array<i64: 2, 256>}, {transform_indices = @transform_5, window_bounds = array<i64: 2, 4, 256>}, {transform_indices = @transform_6, window_bounds = array<i64: 1, 4, 2>}]} {
    %c0_i32 = arith.constant 0 : i32
    %0 = arith.cmpi eq, %arg1, %c0_i32 : i32
    %1 = arith.extui %0 : i1 to i32
    %c0_i32_0 = arith.constant 0 : i32
    %2 = arith.cmpi ne, %1, %c0_i32_0 : i32
    scf.if %2 {
      %cst_120 = arith.constant 0.000000e+00 : f32
      %186 = vector.broadcast %cst_120 : f32 to vector<1x4x2xf32>
      %c0_121 = arith.constant 0 : index
      %c0_122 = arith.constant 0 : index
      %c0_123 = arith.constant 0 : index
      %187 = vector.load %arg8[%c0_121, %c0_122, %c0_123] : memref<1x4x2xf32, #tpu.memory_space<vmem>>, vector<1x4x2xf32>
      tpu.vector_store %arg8[%c0_121, %c0_122, %c0_123], %186 {strides = array<i32>} : memref<1x4x2xf32, #tpu.memory_space<vmem>>, vector<1x4x2xf32>,
    } else {
    }
    %cst = arith.constant 0.000000e+00 : f32
    %3 = vector.broadcast %cst : f32 to vector<4x2xf32>
    %c0 = arith.constant 0 : index
    %c0_1 = arith.constant 0 : index
    %c0_2 = arith.constant 0 : index
    %4 = vector.load %arg2[%c0, %c0_1, %c0_2] : memref<2x4x256xbf16, #tpu.memory_space<vmem>>, vector<1x4x256xbf16>
    %5 = vector.shape_cast %4 : vector<1x4x256xbf16> to vector<4x256xbf16>
    %6 = arith.extf %5 : vector<4x256xbf16> to vector<4x256xf32>
    %c0_3 = arith.constant 0 : index
    %c0_4 = arith.constant 0 : index
    %7 = vector.load %arg3[%c0_3, %c0_4] : memref<4x1xf32, #tpu.memory_space<vmem>>, vector<4x1xf32>
    %8 = vector.broadcast %7 : vector<4x1xf32> to vector<4x256xf32>
    %9 = arith.mulf %6, %8 : vector<4x256xf32>
    %c0_5 = arith.constant 0 : index
    %c0_6 = arith.constant 0 : index
    %10 = vector.load %arg4[%c0_5, %c0_6] : memref<4x1xf32, #tpu.memory_space<vmem>>, vector<4x1xf32>
    %11 = vector.broadcast %10 : vector<4x1xf32> to vector<4x256xf32>
    %12 = arith.addf %9, %11 : vector<4x256xf32>
    %cst_7 = arith.constant 0.000000e+00 : f32
    %13 = vector.broadcast %cst_7 : f32 to vector<4x256xf32>
    %14 = arith.maximumf %12, %13 : vector<4x256xf32>
    %15 = arith.truncf %14 : vector<4x256xf32> to vector<4x256xbf16>
    %cst_8 = arith.constant 0.000000e+00 : bf16
    %16 = vector.broadcast %cst_8 : bf16 to vector<4x1xbf16>
    %17 = vector.extract_strided_slice %15 {offsets = [0, 0], sizes = [4, 255], strides = [1, 1]} : vector<4x256xbf16> to vector<4x255xbf16>
    %18 = tpu.concatenate %16, %17 in 1 : vector<4x1xbf16>, vector<4x255xbf16> -> vector<4x256xbf16>
    %c0_9 = arith.constant 0 : index
    %c0_10 = arith.constant 0 : index
    %19 = vector.load %arg6[%c0_9, %c0_10] : memref<2x256xbf16, #tpu.memory_space<vmem>>, vector<1x256xbf16>
    %20 = vector.broadcast %19 : vector<1x256xbf16> to vector<4x256xbf16>
    %21 = arith.mulf %18, %20 : vector<4x256xbf16>
    %cst_11 = arith.constant 0.000000e+00 : bf16
    %22 = vector.broadcast %cst_11 : bf16 to vector<4x1xbf16>
    %23 = vector.extract_strided_slice %15 {offsets = [0, 1], sizes = [4, 255], strides = [1, 1]} : vector<4x256xbf16> to vector<4x255xbf16>
    %24 = tpu.concatenate %23, %22 in 1 : vector<4x255xbf16>, vector<4x1xbf16> -> vector<4x256xbf16>
    %c1 = arith.constant 1 : index
    %c0_12 = arith.constant 0 : index
    %25 = vector.load %arg6[%c1, %c0_12] : memref<2x256xbf16, #tpu.memory_space<vmem>>, vector<1x256xbf16>
    %26 = vector.broadcast %25 : vector<1x256xbf16> to vector<4x256xbf16>
    %27 = arith.mulf %24, %26 : vector<4x256xbf16>
    %cst_13 = arith.constant 0.000000e+00 : bf16
    %28 = vector.broadcast %cst_13 : bf16 to vector<4x16xbf16>
    %29 = vector.extract_strided_slice %21 {offsets = [0, 0], sizes = [4, 240], strides = [1, 1]} : vector<4x256xbf16> to vector<4x240xbf16>
    %30 = tpu.concatenate %28, %29 in 1 : vector<4x16xbf16>, vector<4x240xbf16> -> vector<4x256xbf16>
    %c0_14 = arith.constant 0 : index
    %c0_15 = arith.constant 0 : index
    %c0_16 = arith.constant 0 : index
    %31 = vector.load %arg5[%c0_14, %c0_15, %c0_16] : memref<9x4x4xbf16, #tpu.memory_space<vmem>>, vector<1x4x4xbf16>
    %32 = vector.shape_cast %31 : vector<1x4x4xbf16> to vector<4x4xbf16>
    %cst_17 = arith.constant dense<0.000000e+00> : vector<4x256xf32>
    %33 = tpu.matmul %32, %30, %cst_17 {dimension_numbers = #tpu.dot_dimension_numbers<[1], [0], [0], [1], [0, 0, 1, 1], [], []>} : vector<4x4xbf16>, vector<4x256xbf16>, vector<4x256xf32> -> vector<4x256xf32>
    %cst_18 = arith.constant 0.000000e+00 : bf16
    %34 = vector.broadcast %cst_18 : bf16 to vector<4x16xbf16>
    %35 = vector.extract_strided_slice %15 {offsets = [0, 0], sizes = [4, 240], strides = [1, 1]} : vector<4x256xbf16> to vector<4x240xbf16>
    %36 = tpu.concatenate %34, %35 in 1 : vector<4x16xbf16>, vector<4x240xbf16> -> vector<4x256xbf16>
    %c1_19 = arith.constant 1 : index
    %c0_20 = arith.constant 0 : index
    %c0_21 = arith.constant 0 : index
    %37 = vector.load %arg5[%c1_19, %c0_20, %c0_21] : memref<9x4x4xbf16, #tpu.memory_space<vmem>>, vector<1x4x4xbf16>
    %38 = vector.shape_cast %37 : vector<1x4x4xbf16> to vector<4x4xbf16>
    %cst_22 = arith.constant dense<0.000000e+00> : vector<4x256xf32>
    %39 = tpu.matmul %38, %36, %cst_22 {dimension_numbers = #tpu.dot_dimension_numbers<[1], [0], [0], [1], [0, 0, 1, 1], [], []>} : vector<4x4xbf16>, vector<4x256xbf16>, vector<4x256xf32> -> vector<4x256xf32>
    %40 = arith.addf %33, %39 : vector<4x256xf32>
    %cst_23 = arith.constant 0.000000e+00 : bf16
    %41 = vector.broadcast %cst_23 : bf16 to vector<4x16xbf16>
    %42 = vector.extract_strided_slice %27 {offsets = [0, 0], sizes = [4, 240], strides = [1, 1]} : vector<4x256xbf16> to vector<4x240xbf16>
    %43 = tpu.concatenate %41, %42 in 1 : vector<4x16xbf16>, vector<4x240xbf16> -> vector<4x256xbf16>
    %c2 = arith.constant 2 : index
    %c0_24 = arith.constant 0 : index
    %c0_25 = arith.constant 0 : index
    %44 = vector.load %arg5[%c2, %c0_24, %c0_25] : memref<9x4x4xbf16, #tpu.memory_space<vmem>>, vector<1x4x4xbf16>
    %45 = vector.shape_cast %44 : vector<1x4x4xbf16> to vector<4x4xbf16>
    %cst_26 = arith.constant dense<0.000000e+00> : vector<4x256xf32>
    %46 = tpu.matmul %45, %43, %cst_26 {dimension_numbers = #tpu.dot_dimension_numbers<[1], [0], [0], [1], [0, 0, 1, 1], [], []>} : vector<4x4xbf16>, vector<4x256xbf16>, vector<4x256xf32> -> vector<4x256xf32>
    %47 = arith.addf %40, %46 : vector<4x256xf32>
    %c3 = arith.constant 3 : index
    %c0_27 = arith.constant 0 : index
    %c0_28 = arith.constant 0 : index
    %48 = vector.load %arg5[%c3, %c0_27, %c0_28] : memref<9x4x4xbf16, #tpu.memory_space<vmem>>, vector<1x4x4xbf16>
    %49 = vector.shape_cast %48 : vector<1x4x4xbf16> to vector<4x4xbf16>
    %cst_29 = arith.constant dense<0.000000e+00> : vector<4x256xf32>
    %50 = tpu.matmul %49, %21, %cst_29 {dimension_numbers = #tpu.dot_dimension_numbers<[1], [0], [0], [1], [0, 0, 1, 1], [], []>} : vector<4x4xbf16>, vector<4x256xbf16>, vector<4x256xf32> -> vector<4x256xf32>
    %51 = arith.addf %47, %50 : vector<4x256xf32>
    %c4 = arith.constant 4 : index
    %c0_30 = arith.constant 0 : index
    %c0_31 = arith.constant 0 : index
    %52 = vector.load %arg5[%c4, %c0_30, %c0_31] : memref<9x4x4xbf16, #tpu.memory_space<vmem>>, vector<1x4x4xbf16>
    %53 = vector.shape_cast %52 : vector<1x4x4xbf16> to vector<4x4xbf16>
    %cst_32 = arith.constant dense<0.000000e+00> : vector<4x256xf32>
    %54 = tpu.matmul %53, %15, %cst_32 {dimension_numbers = #tpu.dot_dimension_numbers<[1], [0], [0], [1], [0, 0, 1, 1], [], []>} : vector<4x4xbf16>, vector<4x256xbf16>, vector<4x256xf32> -> vector<4x256xf32>
    %55 = arith.addf %51, %54 : vector<4x256xf32>
    %c5 = arith.constant 5 : index
    %c0_33 = arith.constant 0 : index
    %c0_34 = arith.constant 0 : index
    %56 = vector.load %arg5[%c5, %c0_33, %c0_34] : memref<9x4x4xbf16, #tpu.memory_space<vmem>>, vector<1x4x4xbf16>
    %57 = vector.shape_cast %56 : vector<1x4x4xbf16> to vector<4x4xbf16>
    %cst_35 = arith.constant dense<0.000000e+00> : vector<4x256xf32>
    %58 = tpu.matmul %57, %27, %cst_35 {dimension_numbers = #tpu.dot_dimension_numbers<[1], [0], [0], [1], [0, 0, 1, 1], [], []>} : vector<4x4xbf16>, vector<4x256xbf16>, vector<4x256xf32> -> vector<4x256xf32>
    %59 = arith.addf %55, %58 : vector<4x256xf32>
    %cst_36 = arith.constant 0.000000e+00 : bf16
    %60 = vector.broadcast %cst_36 : bf16 to vector<4x16xbf16>
    %61 = vector.extract_strided_slice %21 {offsets = [0, 16], sizes = [4, 240], strides = [1, 1]} : vector<4x256xbf16> to vector<4x240xbf16>
    %62 = tpu.concatenate %61, %60 in 1 : vector<4x240xbf16>, vector<4x16xbf16> -> vector<4x256xbf16>
    %c6 = arith.constant 6 : index
    %c0_37 = arith.constant 0 : index
    %c0_38 = arith.constant 0 : index
    %63 = vector.load %arg5[%c6, %c0_37, %c0_38] : memref<9x4x4xbf16, #tpu.memory_space<vmem>>, vector<1x4x4xbf16>
    %64 = vector.shape_cast %63 : vector<1x4x4xbf16> to vector<4x4xbf16>
    %cst_39 = arith.constant dense<0.000000e+00> : vector<4x256xf32>
    %65 = tpu.matmul %64, %62, %cst_39 {dimension_numbers = #tpu.dot_dimension_numbers<[1], [0], [0], [1], [0, 0, 1, 1], [], []>} : vector<4x4xbf16>, vector<4x256xbf16>, vector<4x256xf32> -> vector<4x256xf32>
    %66 = arith.addf %59, %65 : vector<4x256xf32>
    %cst_40 = arith.constant 0.000000e+00 : bf16
    %67 = vector.broadcast %cst_40 : bf16 to vector<4x16xbf16>
    %68 = vector.extract_strided_slice %15 {offsets = [0, 16], sizes = [4, 240], strides = [1, 1]} : vector<4x256xbf16> to vector<4x240xbf16>
    %69 = tpu.concatenate %68, %67 in 1 : vector<4x240xbf16>, vector<4x16xbf16> -> vector<4x256xbf16>
    %c7 = arith.constant 7 : index
    %c0_41 = arith.constant 0 : index
    %c0_42 = arith.constant 0 : index
    %70 = vector.load %arg5[%c7, %c0_41, %c0_42] : memref<9x4x4xbf16, #tpu.memory_space<vmem>>, vector<1x4x4xbf16>
    %71 = vector.shape_cast %70 : vector<1x4x4xbf16> to vector<4x4xbf16>
    %cst_43 = arith.constant dense<0.000000e+00> : vector<4x256xf32>
    %72 = tpu.matmul %71, %69, %cst_43 {dimension_numbers = #tpu.dot_dimension_numbers<[1], [0], [0], [1], [0, 0, 1, 1], [], []>} : vector<4x4xbf16>, vector<4x256xbf16>, vector<4x256xf32> -> vector<4x256xf32>
    %73 = arith.addf %66, %72 : vector<4x256xf32>
    %cst_44 = arith.constant 0.000000e+00 : bf16
    %74 = vector.broadcast %cst_44 : bf16 to vector<4x16xbf16>
    %75 = vector.extract_strided_slice %27 {offsets = [0, 16], sizes = [4, 240], strides = [1, 1]} : vector<4x256xbf16> to vector<4x240xbf16>
    %76 = tpu.concatenate %75, %74 in 1 : vector<4x240xbf16>, vector<4x16xbf16> -> vector<4x256xbf16>
    %c8 = arith.constant 8 : index
    %c0_45 = arith.constant 0 : index
    %c0_46 = arith.constant 0 : index
    %77 = vector.load %arg5[%c8, %c0_45, %c0_46] : memref<9x4x4xbf16, #tpu.memory_space<vmem>>, vector<1x4x4xbf16>
    %78 = vector.shape_cast %77 : vector<1x4x4xbf16> to vector<4x4xbf16>
    %cst_47 = arith.constant dense<0.000000e+00> : vector<4x256xf32>
    %79 = tpu.matmul %78, %76, %cst_47 {dimension_numbers = #tpu.dot_dimension_numbers<[1], [0], [0], [1], [0, 0, 1, 1], [], []>} : vector<4x4xbf16>, vector<4x256xbf16>, vector<4x256xf32> -> vector<4x256xf32>
    %80 = arith.addf %73, %79 : vector<4x256xf32>
    %81 = arith.truncf %80 : vector<4x256xf32> to vector<4x256xbf16>
    %c0_48 = arith.constant 0 : index
    %c0_49 = arith.constant 0 : index
    %c0_50 = arith.constant 0 : index
    %82 = vector.load %arg7[%c0_48, %c0_49, %c0_50] : memref<2x4x256xbf16, #tpu.memory_space<vmem>>, vector<1x4x256xbf16>
    %83 = vector.shape_cast %82 : vector<1x4x256xbf16> to vector<4x256xbf16>
    %84 = vector.shape_cast %81 : vector<4x256xbf16> to vector<1x4x256xbf16>
    tpu.vector_store %arg7[%c0_48, %c0_49, %c0_50], %84 {strides = array<i32>} : memref<2x4x256xbf16, #tpu.memory_space<vmem>>, vector<1x4x256xbf16>,
    %cst_51 = arith.constant dense<0.000000e+00> : vector<4xf32>
    %85 = vector.multi_reduction <add>, %80, %cst_51 [1] : vector<4x256xf32> to vector<4xf32>
    %86 = vector.shape_cast %85 : vector<4xf32> to vector<4x1xf32>
    %87 = arith.mulf %80, %80 : vector<4x256xf32>
    %cst_52 = arith.constant dense<0.000000e+00> : vector<4xf32>
    %88 = vector.multi_reduction <add>, %87, %cst_52 [1] : vector<4x256xf32> to vector<4xf32>
    %89 = vector.shape_cast %88 : vector<4xf32> to vector<4x1xf32>
    %90 = tpu.concatenate %86, %89 in 1 : vector<4x1xf32>, vector<4x1xf32> -> vector<4x2xf32>
    %91 = arith.addf %3, %90 : vector<4x2xf32>
    %c1_53 = arith.constant 1 : index
    %c0_54 = arith.constant 0 : index
    %c0_55 = arith.constant 0 : index
    %92 = vector.load %arg2[%c1_53, %c0_54, %c0_55] : memref<2x4x256xbf16, #tpu.memory_space<vmem>>, vector<1x4x256xbf16>
    %93 = vector.shape_cast %92 : vector<1x4x256xbf16> to vector<4x256xbf16>
    %94 = arith.extf %93 : vector<4x256xbf16> to vector<4x256xf32>
    %c0_56 = arith.constant 0 : index
    %c0_57 = arith.constant 0 : index
    %95 = vector.load %arg3[%c0_56, %c0_57] : memref<4x1xf32, #tpu.memory_space<vmem>>, vector<4x1xf32>
    %96 = vector.broadcast %95 : vector<4x1xf32> to vector<4x256xf32>
    %97 = arith.mulf %94, %96 : vector<4x256xf32>
    %c0_58 = arith.constant 0 : index
    %c0_59 = arith.constant 0 : index
    %98 = vector.load %arg4[%c0_58, %c0_59] : memref<4x1xf32, #tpu.memory_space<vmem>>, vector<4x1xf32>
    %99 = vector.broadcast %98 : vector<4x1xf32> to vector<4x256xf32>
    %100 = arith.addf %97, %99 : vector<4x256xf32>
    %cst_60 = arith.constant 0.000000e+00 : f32
    %101 = vector.broadcast %cst_60 : f32 to vector<4x256xf32>
    %102 = arith.maximumf %100, %101 : vector<4x256xf32>
    %103 = arith.truncf %102 : vector<4x256xf32> to vector<4x256xbf16>
    %cst_61 = arith.constant 0.000000e+00 : bf16
    %104 = vector.broadcast %cst_61 : bf16 to vector<4x1xbf16>
    %105 = vector.extract_strided_slice %103 {offsets = [0, 0], sizes = [4, 255], strides = [1, 1]} : vector<4x256xbf16> to vector<4x255xbf16>
    %106 = tpu.concatenate %104, %105 in 1 : vector<4x1xbf16>, vector<4x255xbf16> -> vector<4x256xbf16>
    %c0_62 = arith.constant 0 : index
    %c0_63 = arith.constant 0 : index
    %107 = vector.load %arg6[%c0_62, %c0_63] : memref<2x256xbf16, #tpu.memory_space<vmem>>, vector<1x256xbf16>
    %108 = vector.broadcast %107 : vector<1x256xbf16> to vector<4x256xbf16>
    %109 = arith.mulf %106, %108 : vector<4x256xbf16>
    %cst_64 = arith.constant 0.000000e+00 : bf16
    %110 = vector.broadcast %cst_64 : bf16 to vector<4x1xbf16>
    %111 = vector.extract_strided_slice %103 {offsets = [0, 1], sizes = [4, 255], strides = [1, 1]} : vector<4x256xbf16> to vector<4x255xbf16>
    %112 = tpu.concatenate %111, %110 in 1 : vector<4x255xbf16>, vector<4x1xbf16> -> vector<4x256xbf16>
    %c1_65 = arith.constant 1 : index
    %c0_66 = arith.constant 0 : index
    %113 = vector.load %arg6[%c1_65, %c0_66] : memref<2x256xbf16, #tpu.memory_space<vmem>>, vector<1x256xbf16>
    %114 = vector.broadcast %113 : vector<1x256xbf16> to vector<4x256xbf16>
    %115 = arith.mulf %112, %114 : vector<4x256xbf16>
    %cst_67 = arith.constant 0.000000e+00 : bf16
    %116 = vector.broadcast %cst_67 : bf16 to vector<4x16xbf16>
    %117 = vector.extract_strided_slice %109 {offsets = [0, 0], sizes = [4, 240], strides = [1, 1]} : vector<4x256xbf16> to vector<4x240xbf16>
    %118 = tpu.concatenate %116, %117 in 1 : vector<4x16xbf16>, vector<4x240xbf16> -> vector<4x256xbf16>
    %c0_68 = arith.constant 0 : index
    %c0_69 = arith.constant 0 : index
    %c0_70 = arith.constant 0 : index
    %119 = vector.load %arg5[%c0_68, %c0_69, %c0_70] : memref<9x4x4xbf16, #tpu.memory_space<vmem>>, vector<1x4x4xbf16>
    %120 = vector.shape_cast %119 : vector<1x4x4xbf16> to vector<4x4xbf16>
    %cst_71 = arith.constant dense<0.000000e+00> : vector<4x256xf32>
    %121 = tpu.matmul %120, %118, %cst_71 {dimension_numbers = #tpu.dot_dimension_numbers<[1], [0], [0], [1], [0, 0, 1, 1], [], []>} : vector<4x4xbf16>, vector<4x256xbf16>, vector<4x256xf32> -> vector<4x256xf32>
    %cst_72 = arith.constant 0.000000e+00 : bf16
    %122 = vector.broadcast %cst_72 : bf16 to vector<4x16xbf16>
    %123 = vector.extract_strided_slice %103 {offsets = [0, 0], sizes = [4, 240], strides = [1, 1]} : vector<4x256xbf16> to vector<4x240xbf16>
    %124 = tpu.concatenate %122, %123 in 1 : vector<4x16xbf16>, vector<4x240xbf16> -> vector<4x256xbf16>
    %c1_73 = arith.constant 1 : index
    %c0_74 = arith.constant 0 : index
    %c0_75 = arith.constant 0 : index
    %125 = vector.load %arg5[%c1_73, %c0_74, %c0_75] : memref<9x4x4xbf16, #tpu.memory_space<vmem>>, vector<1x4x4xbf16>
    %126 = vector.shape_cast %125 : vector<1x4x4xbf16> to vector<4x4xbf16>
    %cst_76 = arith.constant dense<0.000000e+00> : vector<4x256xf32>
    %127 = tpu.matmul %126, %124, %cst_76 {dimension_numbers = #tpu.dot_dimension_numbers<[1], [0], [0], [1], [0, 0, 1, 1], [], []>} : vector<4x4xbf16>, vector<4x256xbf16>, vector<4x256xf32> -> vector<4x256xf32>
    %128 = arith.addf %121, %127 : vector<4x256xf32>
    %cst_77 = arith.constant 0.000000e+00 : bf16
    %129 = vector.broadcast %cst_77 : bf16 to vector<4x16xbf16>
    %130 = vector.extract_strided_slice %115 {offsets = [0, 0], sizes = [4, 240], strides = [1, 1]} : vector<4x256xbf16> to vector<4x240xbf16>
    %131 = tpu.concatenate %129, %130 in 1 : vector<4x16xbf16>, vector<4x240xbf16> -> vector<4x256xbf16>
    %c2_78 = arith.constant 2 : index
    %c0_79 = arith.constant 0 : index
    %c0_80 = arith.constant 0 : index
    %132 = vector.load %arg5[%c2_78, %c0_79, %c0_80] : memref<9x4x4xbf16, #tpu.memory_space<vmem>>, vector<1x4x4xbf16>
    %133 = vector.shape_cast %132 : vector<1x4x4xbf16> to vector<4x4xbf16>
    %cst_81 = arith.constant dense<0.000000e+00> : vector<4x256xf32>
    %134 = tpu.matmul %133, %131, %cst_81 {dimension_numbers = #tpu.dot_dimension_numbers<[1], [0], [0], [1], [0, 0, 1, 1], [], []>} : vector<4x4xbf16>, vector<4x256xbf16>, vector<4x256xf32> -> vector<4x256xf32>
    %135 = arith.addf %128, %134 : vector<4x256xf32>
    %c3_82 = arith.constant 3 : index
    %c0_83 = arith.constant 0 : index
    %c0_84 = arith.constant 0 : index
    %136 = vector.load %arg5[%c3_82, %c0_83, %c0_84] : memref<9x4x4xbf16, #tpu.memory_space<vmem>>, vector<1x4x4xbf16>
    %137 = vector.shape_cast %136 : vector<1x4x4xbf16> to vector<4x4xbf16>
    %cst_85 = arith.constant dense<0.000000e+00> : vector<4x256xf32>
    %138 = tpu.matmul %137, %109, %cst_85 {dimension_numbers = #tpu.dot_dimension_numbers<[1], [0], [0], [1], [0, 0, 1, 1], [], []>} : vector<4x4xbf16>, vector<4x256xbf16>, vector<4x256xf32> -> vector<4x256xf32>
    %139 = arith.addf %135, %138 : vector<4x256xf32>
    %c4_86 = arith.constant 4 : index
    %c0_87 = arith.constant 0 : index
    %c0_88 = arith.constant 0 : index
    %140 = vector.load %arg5[%c4_86, %c0_87, %c0_88] : memref<9x4x4xbf16, #tpu.memory_space<vmem>>, vector<1x4x4xbf16>
    %141 = vector.shape_cast %140 : vector<1x4x4xbf16> to vector<4x4xbf16>
    %cst_89 = arith.constant dense<0.000000e+00> : vector<4x256xf32>
    %142 = tpu.matmul %141, %103, %cst_89 {dimension_numbers = #tpu.dot_dimension_numbers<[1], [0], [0], [1], [0, 0, 1, 1], [], []>} : vector<4x4xbf16>, vector<4x256xbf16>, vector<4x256xf32> -> vector<4x256xf32>
    %143 = arith.addf %139, %142 : vector<4x256xf32>
    %c5_90 = arith.constant 5 : index
    %c0_91 = arith.constant 0 : index
    %c0_92 = arith.constant 0 : index
    %144 = vector.load %arg5[%c5_90, %c0_91, %c0_92] : memref<9x4x4xbf16, #tpu.memory_space<vmem>>, vector<1x4x4xbf16>
    %145 = vector.shape_cast %144 : vector<1x4x4xbf16> to vector<4x4xbf16>
    %cst_93 = arith.constant dense<0.000000e+00> : vector<4x256xf32>
    %146 = tpu.matmul %145, %115, %cst_93 {dimension_numbers = #tpu.dot_dimension_numbers<[1], [0], [0], [1], [0, 0, 1, 1], [], []>} : vector<4x4xbf16>, vector<4x256xbf16>, vector<4x256xf32> -> vector<4x256xf32>
    %147 = arith.addf %143, %146 : vector<4x256xf32>
    %cst_94 = arith.constant 0.000000e+00 : bf16
    %148 = vector.broadcast %cst_94 : bf16 to vector<4x16xbf16>
    %149 = vector.extract_strided_slice %109 {offsets = [0, 16], sizes = [4, 240], strides = [1, 1]} : vector<4x256xbf16> to vector<4x240xbf16>
    %150 = tpu.concatenate %149, %148 in 1 : vector<4x240xbf16>, vector<4x16xbf16> -> vector<4x256xbf16>
    %c6_95 = arith.constant 6 : index
    %c0_96 = arith.constant 0 : index
    %c0_97 = arith.constant 0 : index
    %151 = vector.load %arg5[%c6_95, %c0_96, %c0_97] : memref<9x4x4xbf16, #tpu.memory_space<vmem>>, vector<1x4x4xbf16>
    %152 = vector.shape_cast %151 : vector<1x4x4xbf16> to vector<4x4xbf16>
    %cst_98 = arith.constant dense<0.000000e+00> : vector<4x256xf32>
    %153 = tpu.matmul %152, %150, %cst_98 {dimension_numbers = #tpu.dot_dimension_numbers<[1], [0], [0], [1], [0, 0, 1, 1], [], []>} : vector<4x4xbf16>, vector<4x256xbf16>, vector<4x256xf32> -> vector<4x256xf32>
    %154 = arith.addf %147, %153 : vector<4x256xf32>
    %cst_99 = arith.constant 0.000000e+00 : bf16
    %155 = vector.broadcast %cst_99 : bf16 to vector<4x16xbf16>
    %156 = vector.extract_strided_slice %103 {offsets = [0, 16], sizes = [4, 240], strides = [1, 1]} : vector<4x256xbf16> to vector<4x240xbf16>
    %157 = tpu.concatenate %156, %155 in 1 : vector<4x240xbf16>, vector<4x16xbf16> -> vector<4x256xbf16>
    %c7_100 = arith.constant 7 : index
    %c0_101 = arith.constant 0 : index
    %c0_102 = arith.constant 0 : index
    %158 = vector.load %arg5[%c7_100, %c0_101, %c0_102] : memref<9x4x4xbf16, #tpu.memory_space<vmem>>, vector<1x4x4xbf16>
    %159 = vector.shape_cast %158 : vector<1x4x4xbf16> to vector<4x4xbf16>
    %cst_103 = arith.constant dense<0.000000e+00> : vector<4x256xf32>
    %160 = tpu.matmul %159, %157, %cst_103 {dimension_numbers = #tpu.dot_dimension_numbers<[1], [0], [0], [1], [0, 0, 1, 1], [], []>} : vector<4x4xbf16>, vector<4x256xbf16>, vector<4x256xf32> -> vector<4x256xf32>
    %161 = arith.addf %154, %160 : vector<4x256xf32>
    %cst_104 = arith.constant 0.000000e+00 : bf16
    %162 = vector.broadcast %cst_104 : bf16 to vector<4x16xbf16>
    %163 = vector.extract_strided_slice %115 {offsets = [0, 16], sizes = [4, 240], strides = [1, 1]} : vector<4x256xbf16> to vector<4x240xbf16>
    %164 = tpu.concatenate %163, %162 in 1 : vector<4x240xbf16>, vector<4x16xbf16> -> vector<4x256xbf16>
    %c8_105 = arith.constant 8 : index
    %c0_106 = arith.constant 0 : index
    %c0_107 = arith.constant 0 : index
    %165 = vector.load %arg5[%c8_105, %c0_106, %c0_107] : memref<9x4x4xbf16, #tpu.memory_space<vmem>>, vector<1x4x4xbf16>
    %166 = vector.shape_cast %165 : vector<1x4x4xbf16> to vector<4x4xbf16>
    %cst_108 = arith.constant dense<0.000000e+00> : vector<4x256xf32>
    %167 = tpu.matmul %166, %164, %cst_108 {dimension_numbers = #tpu.dot_dimension_numbers<[1], [0], [0], [1], [0, 0, 1, 1], [], []>} : vector<4x4xbf16>, vector<4x256xbf16>, vector<4x256xf32> -> vector<4x256xf32>
    %168 = arith.addf %161, %167 : vector<4x256xf32>
    %169 = arith.truncf %168 : vector<4x256xf32> to vector<4x256xbf16>
    %c1_109 = arith.constant 1 : index
    %c0_110 = arith.constant 0 : index
    %c0_111 = arith.constant 0 : index
    %170 = vector.load %arg7[%c1_109, %c0_110, %c0_111] : memref<2x4x256xbf16, #tpu.memory_space<vmem>>, vector<1x4x256xbf16>
    %171 = vector.shape_cast %170 : vector<1x4x256xbf16> to vector<4x256xbf16>
    %172 = vector.shape_cast %169 : vector<4x256xbf16> to vector<1x4x256xbf16>
    tpu.vector_store %arg7[%c1_109, %c0_110, %c0_111], %172 {strides = array<i32>} : memref<2x4x256xbf16, #tpu.memory_space<vmem>>, vector<1x4x256xbf16>,
    %cst_112 = arith.constant dense<0.000000e+00> : vector<4xf32>
    %173 = vector.multi_reduction <add>, %168, %cst_112 [1] : vector<4x256xf32> to vector<4xf32>
    %174 = vector.shape_cast %173 : vector<4xf32> to vector<4x1xf32>
    %175 = arith.mulf %168, %168 : vector<4x256xf32>
    %cst_113 = arith.constant dense<0.000000e+00> : vector<4xf32>
    %176 = vector.multi_reduction <add>, %175, %cst_113 [1] : vector<4x256xf32> to vector<4xf32>
    %177 = vector.shape_cast %176 : vector<4xf32> to vector<4x1xf32>
    %178 = tpu.concatenate %174, %177 in 1 : vector<4x1xf32>, vector<4x1xf32> -> vector<4x2xf32>
    %179 = arith.addf %91, %178 : vector<4x2xf32>
    %c0_114 = arith.constant 0 : index
    %c0_115 = arith.constant 0 : index
    %c0_116 = arith.constant 0 : index
    %180 = vector.load %arg8[%c0_114, %c0_115, %c0_116] : memref<1x4x2xf32, #tpu.memory_space<vmem>>, vector<1x4x2xf32>
    %181 = vector.shape_cast %180 : vector<1x4x2xf32> to vector<4x2xf32>
    %182 = arith.addf %181, %179 : vector<4x2xf32>
    %c0_117 = arith.constant 0 : index
    %c0_118 = arith.constant 0 : index
    %c0_119 = arith.constant 0 : index
    %183 = vector.load %arg8[%c0_117, %c0_118, %c0_119] : memref<1x4x2xf32, #tpu.memory_space<vmem>>, vector<1x4x2xf32>
    %184 = vector.shape_cast %183 : vector<1x4x2xf32> to vector<4x2xf32>
    %185 = vector.shape_cast %182 : vector<4x2xf32> to vector<1x4x2xf32>
    tpu.vector_store %arg8[%c0_117, %c0_118, %c0_119], %185 {strides = array<i32>} : memref<1x4x2xf32, #tpu.memory_space<vmem>>, vector<1x4x2xf32>,
    return
  }
  func.func @transform_0(%arg0: i32, %arg1: i32) -> (i32, i32, i32) {
    %c1_i32 = arith.constant 1 : i32
    %0 = arith.muli %arg0, %c1_i32 : i32
    %1 = arith.addi %0, %arg1 : i32
    %c0_i32 = arith.constant 0 : i32
    %c0_i32_0 = arith.constant 0 : i32
    %c0_i32_1 = arith.constant 0 : i32
    return %1, %c0_i32, %c0_i32_0 : i32, i32, i32
  }
  func.func @transform_1(%arg0: i32, %arg1: i32) -> (i32, i32) {
    %c0_i32 = arith.constant 0 : i32
    %c0_i32_0 = arith.constant 0 : i32
    %c0_i32_1 = arith.constant 0 : i32
    return %c0_i32, %c0_i32_0 : i32, i32
  }
  func.func @transform_2(%arg0: i32, %arg1: i32) -> (i32, i32) {
    %c0_i32 = arith.constant 0 : i32
    %c0_i32_0 = arith.constant 0 : i32
    %c0_i32_1 = arith.constant 0 : i32
    return %c0_i32, %c0_i32_0 : i32, i32
  }
  func.func @transform_3(%arg0: i32, %arg1: i32) -> (i32, i32, i32) {
    %c0_i32 = arith.constant 0 : i32
    %c0_i32_0 = arith.constant 0 : i32
    %c0_i32_1 = arith.constant 0 : i32
    %c0_i32_2 = arith.constant 0 : i32
    return %c0_i32, %c0_i32_0, %c0_i32_1 : i32, i32, i32
  }
  func.func @transform_4(%arg0: i32, %arg1: i32) -> (i32, i32) {
    %c0_i32 = arith.constant 0 : i32
    %c0_i32_0 = arith.constant 0 : i32
    %c0_i32_1 = arith.constant 0 : i32
    return %c0_i32, %c0_i32_0 : i32, i32
  }
  func.func @transform_5(%arg0: i32, %arg1: i32) -> (i32, i32, i32) {
    %c1_i32 = arith.constant 1 : i32
    %0 = arith.muli %arg0, %c1_i32 : i32
    %1 = arith.addi %0, %arg1 : i32
    %c0_i32 = arith.constant 0 : i32
    %c0_i32_0 = arith.constant 0 : i32
    %c0_i32_1 = arith.constant 0 : i32
    return %1, %c0_i32, %c0_i32_0 : i32, i32, i32
  }
  func.func @transform_6(%arg0: i32, %arg1: i32) -> (i32, i32, i32) {
    %c0_i32 = arith.constant 0 : i32
    %c0_i32_0 = arith.constant 0 : i32
    %c0_i32_1 = arith.constant 0 : i32
    return %arg0, %c0_i32, %c0_i32_0 : i32, i32, i32
  }
}

module attributes {stable_mosaic.version = 11 : i64} {
  func.func @bn_relu_residual_kernel(%arg0: i32, %arg1: memref<8x256xbf16, #tpu.memory_space<vmem>>, %arg2: memref<8x256xf32, #tpu.memory_space<vmem>>, %arg3: memref<8x1xf32, #tpu.memory_space<vmem>>, %arg4: memref<8x1xf32, #tpu.memory_space<vmem>>, %arg5: memref<8x256xf32, #tpu.memory_space<vmem>>) attributes {dimension_semantics = [#tpu.dimension_semantics<parallel>], iteration_bounds = array<i64: 1>, scalar_prefetch = 0 : i64, scratch_operands = 0 : i64, tpu.core_type = #tpu.core_type<tc>, window_params = [{transform_indices = @transform_0, window_bounds = array<i64: 8, 256>}, {transform_indices = @transform_1, window_bounds = array<i64: 8, 256>}, {transform_indices = @transform_2, window_bounds = array<i64: 8, 1>}, {transform_indices = @transform_3, window_bounds = array<i64: 8, 1>}, {transform_indices = @transform_4, window_bounds = array<i64: 8, 256>}]} {
    %c0 = arith.constant 0 : index
    %c0_0 = arith.constant 0 : index
    %0 = vector.load %arg1[%c0, %c0_0] : memref<8x256xbf16, #tpu.memory_space<vmem>>, vector<8x256xbf16>
    %1 = arith.extf %0 : vector<8x256xbf16> to vector<8x256xf32>
    %c0_1 = arith.constant 0 : index
    %c0_2 = arith.constant 0 : index
    %2 = vector.load %arg3[%c0_1, %c0_2] : memref<8x1xf32, #tpu.memory_space<vmem>>, vector<8x1xf32>
    %3 = vector.broadcast %2 : vector<8x1xf32> to vector<8x256xf32>
    %4 = arith.mulf %1, %3 : vector<8x256xf32>
    %c0_3 = arith.constant 0 : index
    %c0_4 = arith.constant 0 : index
    %5 = vector.load %arg4[%c0_3, %c0_4] : memref<8x1xf32, #tpu.memory_space<vmem>>, vector<8x1xf32>
    %6 = vector.broadcast %5 : vector<8x1xf32> to vector<8x256xf32>
    %7 = arith.addf %4, %6 : vector<8x256xf32>
    %cst = arith.constant 0.000000e+00 : f32
    %8 = vector.broadcast %cst : f32 to vector<8x256xf32>
    %9 = arith.maximumf %7, %8 : vector<8x256xf32>
    %c0_5 = arith.constant 0 : index
    %c0_6 = arith.constant 0 : index
    %10 = vector.load %arg2[%c0_5, %c0_6] : memref<8x256xf32, #tpu.memory_space<vmem>>, vector<8x256xf32>
    %11 = arith.addf %9, %10 : vector<8x256xf32>
    %c0_7 = arith.constant 0 : index
    %c0_8 = arith.constant 0 : index
    %12 = vector.load %arg5[%c0_7, %c0_8] : memref<8x256xf32, #tpu.memory_space<vmem>>, vector<8x256xf32>
    tpu.vector_store %arg5[%c0_7, %c0_8], %11 {strides = array<i32>} : memref<8x256xf32, #tpu.memory_space<vmem>>, vector<8x256xf32>,
    return
  }
  func.func @transform_0(%arg0: i32) -> (i32, i32) {
    %c0_i32 = arith.constant 0 : i32
    %c0_i32_0 = arith.constant 0 : i32
    return %arg0, %c0_i32 : i32, i32
  }
  func.func @transform_1(%arg0: i32) -> (i32, i32) {
    %c0_i32 = arith.constant 0 : i32
    %c0_i32_0 = arith.constant 0 : i32
    return %arg0, %c0_i32 : i32, i32
  }
  func.func @transform_2(%arg0: i32) -> (i32, i32) {
    %c0_i32 = arith.constant 0 : i32
    %c0_i32_0 = arith.constant 0 : i32
    return %arg0, %c0_i32 : i32, i32
  }
  func.func @transform_3(%arg0: i32) -> (i32, i32) {
    %c0_i32 = arith.constant 0 : i32
    %c0_i32_0 = arith.constant 0 : i32
    return %arg0, %c0_i32 : i32, i32
  }
  func.func @transform_4(%arg0: i32) -> (i32, i32) {
    %c0_i32 = arith.constant 0 : i32
    %c0_i32_0 = arith.constant 0 : i32
    return %arg0, %c0_i32 : i32, i32
  }
}

</mosaic_0001>

<bundles_post_ra>
// kernel: tile.0
= control target key start
LH: loop header
LB: loop body
LE: loop exit
PB: predicated region body
PF: predicated region fallthrough
CT: control target
= control target key end

     0   :  { %s34_s8 = smov 125   ;;  %vm7_vm0 = vcmask 7168   ;;  %s35_s11 = smov 126   ;;  %s61_s0 = inlined_call_operand.vmem [shape: f32[2,4], index: 0, kind: input, shape index: {}]   ;;  %s62_s1 = inlined_call_operand.vmem [shape: f32[8,1], index: 1, kind: output, shape index: {}]  }
   0x1   :  { %v4_v0 = vld [vmem:[%s61_s0] sm:$0x3]  ;;  %s33_s0 = smov 127  }
   0x2   :  { %5 = vst [vmem:[#allocation0] sm:$0x3] %v4_v0 }
   0x9   :  { %v9_v1 = vld [vmem:[#allocation0] sm:$0x3]  }
   0xa   :  { %v21_v2 = vld [vmem:[#allocation0] sm:$0x3]   ;;  %10 = vrot.lane.b32.xlu0 %v9_v1, %s33_s0 }
   0xb   :  { %22 = vrot.lane.b32.xlu1 %v21_v2, %s34_s8  ;;  %v6_v3 = vld [vmem:[#allocation0] sm:$0x3]  }
   0xc   :  { %v15_v4 = vld [vmem:[#allocation0] sm:$0x3]   ;;  %8 = vst.msk [vmem:[%s62_s1] ss:$4 sm:$0x3] %vm7_vm0, %v6_v3  }
   0xe   :  { %16 = vrot.lane.b32.xlu0 %v15_v4, %s35_s11 }
  0x7c   :  { %v11_v5 = vpop.permute.xlu0 %10  }
  0x7d   :  { %v23_v6 = vpop.permute.xlu1 %22   ;;  %27 = vst.msk [vmem:[%s62_s1 + $0x1] ss:$4 sm:$0x3] %vm7_vm0, %v11_v5  }
  0x7e   :  { %29 = vst.msk [vmem:[%s62_s1 + $0x3] ss:$4 sm:$0x3] %vm7_vm0, %v23_v6  }
  0x80   :  { %v17_v7 = vpop.permute.xlu0 %16  }
  0x81   :  { %28 = vst.msk [vmem:[%s62_s1 + $0x2] ss:$4 sm:$0x3] %vm7_vm0, %v17_v7  }

// kernel: tile.14
= control target key start
LH: loop header
LB: loop body
LE: loop exit
PB: predicated region body
PF: predicated region fallthrough
CT: control target
= control target key end

     0   :  { %s22_s0 = inlined_call_operand.vmem [shape: f32[4], index: 0, kind: input, shape index: {}]   ;;  %s23_s1 = inlined_call_operand.vmem [shape: f32[2,4], index: 1, kind: output, shape index: {}]  }
   0x1   :  { %v4_v0 = vld [vmem:[%s22_s0] ss:$0 sm:$0xff] }
   0x2   :  { %5 = vst [vmem:[%s23_s1] sm:$0x3] %v4_v0 }

// kernel: residual_forward.5
= control target key start
LH: loop header
LB: loop body
LE: loop exit
PB: predicated region body
PF: predicated region fallthrough
CT: control target
= control target key end

     0   :  { %v50_v0 = vmov 0   ;;  %s97_s2 = inlined_call_operand.vmem [shape: f32[8,1], index: 2, kind: input, shape index: {}]   ;;  %s98_s3 = inlined_call_operand.vmem [shape: f32[8,1], index: 3, kind: input, shape index: {}]   ;;  %s99_s0 = inlined_call_operand.vmem [shape: bf16[8,256], index: 0, kind: input, shape index: {}]   ;;  %s100_s1 = inlined_call_operand.vmem [shape: f32[8,256], index: 1, kind: input, shape index: {}]   ;;  %s101_s4 = inlined_call_operand.vmem [shape: f32[8,256], index: 4, kind: output, shape index: {}]  }
   0x1   :  { %49 = vset.pattern.permute.xlu0 %v50_v0  ;;  %v20_v1 = vld [vmem:[%s97_s2] sm:$0xff]  ;;  %v39_v13 = vld [vmem:[%s100_s1 + $0x8] sm:$0xff] }
   0x2   :  { %23 = vperm.xlu0 %49, %v20_v1   ;;  %v28_v2 = vld [vmem:[%s98_s3] sm:$0xff] }
   0x3   :  { %v17_v3 = vld [vmem:[%s99_s0] sm:$0xff] }
   0x4   :  { %v18_v4 = vunpack.c.l.bf16 %v17_v3  ;;  %v19_v5 = vunpack.c.h.bf16 %v17_v3  ;;  %v38_v12 = vld [vmem:[%s100_s1] sm:$0xff] }
   0x6   :  { %31 = vperm.xlu0 %49, %v28_v2  }
  0x81   :  { %v24_v6 = vpop.permute.xlu0 %23 }
  0x82   :  { %v26_v7 = vmul.f32 %v24_v6, %v18_v4  ;;  %v27_v8 = vmul.f32 %v24_v6, %v19_v5 }
  0x85   :  { %v32_v9 = vpop.permute.xlu0 %31 }
  0x86   :  { %v34_v10 = vadd.f32 %v32_v9, %v26_v7  ;;  %v35_v11 = vadd.f32 %v32_v9, %v27_v8 }
  0x88   :  { %v36_v14 = vmax.f32 %v34_v10, 0.0  ;;  %v37_v15 = vmax.f32 %v35_v11, 0.0 }
  0x8a   :  { %v40_v16 = vadd.f32 %v38_v12, %v36_v14  ;;  %v41_v17 = vadd.f32 %v39_v13, %v37_v15 }
  0x8c   :  { %42 = vst [vmem:[%s101_s4] sm:$0xff] %v40_v16  ;;  %43 = vst [vmem:[%s101_s4 + $0x8] sm:$0xff] %v41_v17 }

// kernel: residual_forward.3
= control target key start
LH: loop header
LB: loop body
LE: loop exit
PB: predicated region body
PF: predicated region fallthrough
CT: control target
= control target key end

     0   :  { %s1507_s19 = smov 1   ;;  %s1509_s20 = smov 16   ;;  %v1510_v8 = vmov 0   ;;  %v1511_v9 = vmov 1966171168   ;;  %v97_v11 = vlaneseq  ;;  %vm76_vm0 = vcmask 7168   ;;  %s1811_s0 = inlined_call_operand.vmem [shape: f32[2,4,256], index: 0, kind: input, shape index: {}]   ;;  %s1812_s2 = inlined_call_operand.vmem [shape: bf16[2,256], index: 2, kind: input, shape index: {}]   ;;  %s1813_s1 = inlined_call_operand.vmem [shape: bf16[9,4,4], index: 1, kind: input, shape index: {}]   ;;  %s1814_s3 = inlined_call_operand.vmem [shape: bf16[2,4,256], index: 3, kind: output, shape index: {0}]   ;;  %s1815_s4 = inlined_call_operand.vmem [shape: f32[1,4,2], index: 4, kind: output, shape index: {1}]  }
   0x1   :  { %v1403_v0 = vld [vmem:[%s1811_s0 + $0x8] sm:$0xff]  ;;  %v64_v1 = vld [vmem:[%s1811_s0] sm:$0xff]  ;;  %s1508_s0 = smov 127   ;;  %214 = vmatprep.mubr.bf16.mxu0 %v1510_v8  ;;  %848 = vmatprep.mubr.bf16.mxu1 %v1510_v8  ;;  %v95_v10 = vunpack.c.l.s4 %v1511_v9  ;;  %vm128_vm1 = vcmask 1039360   ;;  %vm157_vm2 = vcmask 130048   ;;  %vm176_vm3 = vcmask 1041408  }
   0x2   :  { %v1545_v2 = vpack.c.bf16 %v1403_v0, %v1403_v0  ;;  %v1547_v3 = vpack.c.bf16 %v64_v1, %v64_v1  ;;  %v710_v4 = vcombine.high %v1403_v0, %v1403_v0  ;;  %v66_v5 = vcombine.high %v64_v1, %v64_v1  ;;  %v1404_v15 = vld.sshfl [vmem:[%s1812_s2] sm:$0x11 pattern:$0x75316420]  ;;  %v1375_v59 = vld [vmem:[%s1813_s1 + $0x2] sm:$0x3] }
   0x3   :  { %v96_v12 = vunpack.c.0.s8 %v95_v10  ;;  %v98_v13 = vshrl.u32 %v97_v11, 7  ;;  %v734_v17 = vcombine.high %v1404_v15, %v1404_v15  ;;  %vm172_vm4 = vcmask 31744   ;;  %s1512_s24 = smov 112   ;;  %v1405_v1 = vld [vmem:[%s1813_s1 + $0x2] sm:$0x3] }
   0x4   :  { %716 = vrot.lane.b32.xlu1 %v1545_v2, %s1507_s19  ;;  %72 = vrot.lane.b32.xlu0 %v1547_v3, %s1507_s19  ;;  %v1551_v6 = vpack.c.bf16 %v710_v4, %v710_v4  ;;  %v1553_v7 = vpack.c.bf16 %v66_v5, %v66_v5  ;;  %vm500_vm5 = vcmask 916480   ;;  %vm692_vm6 = vcmask 1043456  }
   0x5   :  { %v99_v14 = vsub.s32 %v96_v12, %v98_v13  ;;  %v113_v18 = vsub.s32 0, %v98_v13  ;;  %vm62_vm7 = vcmask 11264  }
   0x7   :  { %v741_v16 = vrot.slane %v1404_v15, %v99_v14  ;;  %v748_v20 = vrot.slane %v734_v17, %v99_v14  ;;  %v162_v14 = vld [vmem:[%s1813_s1] sm:$0x3] }
   0x8   :  { %718 = vrot.lane.b32.xlu1 %v1551_v6, %s1507_s19  ;;  %74 = vrot.lane.b32.xlu0 %v1553_v7, %s1507_s19 }
   0x9   :  { %v750_v19 = vpack.i.b16 %v741_v16, %v741_v16  ;;  %v757_v22 = vpack.i.b16 %v748_v20, %v748_v20  ;;  %v135_v23 = vshrl.u32 %v741_v16, 16  ;;  %v142_v26 = vshrl.u32 %v748_v20, 16  ;;  %v799_v20 = vld [vmem:[%s1813_s1] sm:$0x3] }
   0xb   :  { %v755_v21 = vrot.slane %v750_v19, %v113_v18  ;;  %v762_v30 = vrot.slane %v757_v22, %v113_v18  ;;  %v136_v31 = vpack.i.b16 %v135_v23, %v135_v23  ;;  %v143_v35 = vpack.i.b16 %v142_v26, %v142_v26 }
   0xc   :  { %126 = vrot.lane.b32.xlu1 %v1553_v7, %s1508_s0  ;;  %124 = vrot.lane.b32.xlu0 %v1547_v3, %s1508_s0 }
   0xd   :  { %v141_v38 = vrot.slane %v136_v31, %v113_v18  ;;  %v148_v40 = vrot.slane %v143_v35, %v113_v18  ;;  %v394_v35 = vsel %vm176_vm3, %v1547_v3, 0 }
  0x10   :  { %767 = vrot.lane.b32.xlu1 %v1551_v6, %s1508_s0  ;;  %765 = vrot.lane.b32.xlu0 %v1545_v2, %s1508_s0 }
  0x14   :  { %165 = vrot.lane.b32.xlu1 %v1553_v7, %s1509_s20  ;;  %163 = vrot.lane.b32.xlu0 %v1547_v3, %s1509_s20 }
  0x18   :  { %802 = vrot.lane.b32.xlu1 %v1551_v6, %s1509_s20  ;;  %800 = vrot.lane.b32.xlu0 %v1545_v2, %s1509_s20 }
  0x76   :  { %v717_v24 = vpop.permute.xlu1 %716  ;;  %v73_v25 = vpop.permute.xlu0 %72 }
  0x77   :  { %v723_v27 = vsel %vm76_vm0, 0, %v717_v24  ;;  %v82_v28 = vsel %vm76_vm0, 0, %v73_v25 }
  0x78   :  { %v1576_v29 = vmul.bf16 %v755_v21, %v82_v28  ;;  %v1578_v32 = vmul.bf16 %v755_v21, %v723_v27 }
  0x7a   :  { %v719_v33 = vpop.permute.xlu1 %718  ;;  %153 = vrot.lane.b32.xlu0 %v1576_v29, %s1509_s20  ;;  %v75_v34 = vpop.permute.xlu0 %74  ;;  %v340_v31 = vsel %vm176_vm3, %v1576_v29, 0 }
  0x7b   :  { %v77_v36 = vsel %vm76_vm0, %v73_v25, %v75_v34  ;;  %v720_v39 = vsel %vm76_vm0, %v717_v24, %v719_v33  ;;  %v1410_v33 = vld [vmem:[%s1813_s1 + $0x4] sm:$0x3]  ;;  %v972_v34 = vsel %vm176_vm3, %v1578_v32, 0 }
  0x7c   :  { %v1583_v37 = vmul.bf16 %v762_v30, %v77_v36  ;;  %v1592_v45 = vmul.bf16 %v762_v30, %v720_v39  ;;  %v1380_v30 = vld [vmem:[%s1813_s1 + $0x4] sm:$0x3] }
  0x7e   :  { %v127_v41 = vpop.permute.xlu1 %126  ;;  %792 = vrot.lane.b32.xlu0 %v1578_v32, %s1509_s20  ;;  %155 = vrot.lane.b32.xlu1 %v1583_v37, %s1509_s20  ;;  %v125_v42 = vpop.permute.xlu0 %124 }
  0x7f   :  { %v133_v43 = vsel %vm128_vm1, %v127_v41, 0  ;;  %v129_v44 = vsel %vm128_vm1, %v125_v42, %v127_v41 }
  0x80   :  { %v1594_v46 = vmul.bf16 %v141_v38, %v129_v44  ;;  %v1596_v47 = vmul.bf16 %v148_v40, %v133_v43  ;;  %v1389_v44 = vld [vmem:[%s1813_s1 + $0xa] sm:$0x3] }
  0x82   :  { %v768_v48 = vpop.permute.xlu1 %767  ;;  %794 = vrot.lane.b32.xlu1 %v1592_v45, %s1509_s20  ;;  %274 = vrot.lane.b32.xlu0 %v1594_v46, %s1509_s20  ;;  %v766_v49 = vpop.permute.xlu0 %765  ;;  %v448_v36 = vsel %vm176_vm3, %v1594_v46, 0 }
  0x83   :  { %v772_v50 = vsel %vm128_vm1, %v768_v48, 0  ;;  %v769_v51 = vsel %vm128_vm1, %v766_v49, %v768_v48  ;;  %v1419_v49 = vld [vmem:[%s1813_s1 + $0xa] sm:$0x3] }
  0x84   :  { %v1604_v52 = vmul.bf16 %v769_v51, %v141_v38  ;;  %v1606_v53 = vmul.bf16 %v772_v50, %v148_v40 }
  0x86   :  { %276 = vrot.lane.b32.xlu1 %v1596_v47, %s1509_s20  ;;  %908 = vrot.lane.b32.xlu0 %v1604_v52, %s1509_s20  ;;  %v166_v54 = vpop.permute.xlu1 %165  ;;  %v164_v55 = vpop.permute.xlu0 %163  ;;  %v1078_v40 = vsel %vm176_vm3, %v1604_v52, 0 }
  0x87   :  { %v167_v56 = vsel %vm157_vm2, %v164_v55, %v166_v54  ;;  %v169_v57 = vsel %vm157_vm2, 0, %v164_v55 }
  0x88   :  { %1376 = vmatprep.subr.msk.bf16.mxu0 %vm176_vm3, %v167_v56  ;;  %v177_v58 = vsel %vm176_vm3, %v169_v57, 0  ;;  %v1392_v56 = vld [vmem:[%s1813_s1 + $0xc] sm:$0x3] }
  0x89   :  { %183 = vmatpush1.bf16.msra.mxu0 %v177_v58 }
  0x8a   :  { %910 = vrot.lane.b32.xlu1 %v1606_v53, %s1509_s20  ;;  %496 = vrot.lane.b32.xlu0 %v1576_v29, %s1512_s24  ;;  %v803_v60 = vpop.permute.xlu1 %802  ;;  %v801_v61 = vpop.permute.xlu0 %800  ;;  %v1383_v29 = vld [vmem:[%s1813_s1 + $0x6] sm:$0x3] }
  0x8b   :  { %v804_v62 = vsel %vm157_vm2, %v801_v61, %v803_v60  ;;  %v806_v63 = vsel %vm157_vm2, 0, %v801_v61  ;;  %v1422_v61 = vld [vmem:[%s1813_s1 + $0xc] sm:$0x3] }
  0x8c   :  { %1377 = vmatmul.mubr.msk.bf16.vlgmr.msra.gmra.mrb[0].mxu0 %vm172_vm4, %v1375_v59  ;;  %1406 = vmatprep.subr.msk.bf16.mxu1 %vm176_vm3, %v804_v62  ;;  %v811_v0 = vsel %vm176_vm3, %v806_v63, 0 }
  0x8d   :  { %817 = vmatpush1.bf16.msra.mxu1 %v811_v0  ;;  %263 = vmatprep.mubr.bf16.mxu0 %v1510_v8 }
  0x8e   :  { %498 = vrot.lane.b32.xlu1 %v1583_v37, %s1512_s24  ;;  %1126 = vrot.lane.b32.xlu0 %v1578_v32, %s1512_s24  ;;  %v1386_v32 = vld [vmem:[%s1813_s1 + $0x8] sm:$0x3] }
  0x90   :  { %1407 = vmatmul.mubr.msk.bf16.vlgmr.msra.gmra.mrb[0].mxu1 %vm172_vm4, %v1405_v1 }
  0x91   :  { %897 = vmatprep.mubr.bf16.mxu1 %v1510_v8 }
  0x92   :  { %1128 = vrot.lane.b32.xlu1 %v1592_v45, %s1512_s24  ;;  %558 = vrot.lane.b32.xlu0 %v1547_v3, %s1512_s24 }
  0x96   :  { %560 = vrot.lane.b32.xlu1 %v1553_v7, %s1512_s24  ;;  %1185 = vrot.lane.b32.xlu0 %v1545_v2, %s1512_s24 }
  0x9a   :  { %1187 = vrot.lane.b32.xlu1 %v1551_v6, %s1512_s24  ;;  %618 = vrot.lane.b32.xlu0 %v1594_v46, %s1512_s24 }
  0x9e   :  { %620 = vrot.lane.b32.xlu1 %v1596_v47, %s1512_s24  ;;  %1244 = vrot.lane.b32.xlu0 %v1604_v52, %s1512_s24 }
  0xa2   :  { %1246 = vrot.lane.b32.xlu1 %v1606_v53, %s1512_s24 }
  0xec   :  { %v154_v4 = vpop.permute.xlu0 %153 }
  0xed   :  { %v161_v5 = vsel %vm157_vm2, 0, %v154_v4 }
  0xee   :  { %v226_v12 = vsel %vm176_vm3, %v161_v5, 0  ;;  %v1395_v5 = vld [vmem:[%s1813_s1 + $0xe] sm:$0x3] }
  0xf0   :  { %v156_v9 = vpop.permute.xlu1 %155  ;;  %v793_v10 = vpop.permute.xlu0 %792 }
  0xf1   :  { %v158_v11 = vsel %vm157_vm2, %v154_v4, %v156_v9  ;;  %v798_v13 = vsel %vm157_vm2, 0, %v793_v10 }
  0xf2   :  { %1378 = vmatprep.subr.msk.bf16.mxu0 %vm176_vm3, %v158_v11  ;;  %v860_v19 = vsel %vm176_vm3, %v798_v13, 0 }
  0xf3   :  { %232 = vmatpush1.bf16.msra.mxu0 %v226_v12  ;;  %v1425_v12 = vld [vmem:[%s1813_s1 + $0xe] sm:$0x3] }
  0xf4   :  { %v795_v15 = vpop.permute.xlu1 %794  ;;  %v275_v16 = vpop.permute.xlu0 %274 }
  0xf5   :  { %v796_v17 = vsel %vm157_vm2, %v793_v10, %v795_v15  ;;  %v280_v18 = vsel %vm157_vm2, 0, %v275_v16  ;;  %v1428_v15 = vld [vmem:[%s1813_s1 + $0x10] sm:$0x3] }
  0xf6   :  { %1379 = vmatmul.mubr.msk.bf16.vlgmr.msra.gmra.mrb[0].mxu0 %vm172_vm4, %v162_v14  ;;  %1408 = vmatprep.subr.msk.bf16.mxu1 %vm176_vm3, %v796_v17  ;;  %v286_v21 = vsel %vm176_vm3, %v280_v18, 0  ;;  %v1398_v14 = vld [vmem:[%s1813_s1 + $0x10] sm:$0x3] }
  0xf7   :  { %866 = vmatpush1.bf16.msra.mxu1 %v860_v19  ;;  %323 = vmatprep.mubr.bf16.mxu0 %v1510_v8 }
  0xf8   :  { %v277_v22 = vpop.permute.xlu1 %276  ;;  %v909_v23 = vpop.permute.xlu0 %908 }
  0xf9   :  { %v278_v24 = vsel %vm157_vm2, %v275_v16, %v277_v22  ;;  %v914_v25 = vsel %vm157_vm2, 0, %v909_v23 }
  0xfa   :  { %1381 = vmatprep.subr.msk.bf16.mxu0 %vm176_vm3, %v278_v24  ;;  %1409 = vmatmul.mubr.msk.bf16.vlgmr.msra.gmra.mrb[0].mxu1 %vm172_vm4, %v799_v20  ;;  %v919_v26 = vsel %vm176_vm3, %v914_v25, 0 }
  0xfb   :  { %292 = vmatpush1.bf16.msra.mxu0 %v286_v21  ;;  %956 = vmatprep.mubr.bf16.mxu1 %v1510_v8 }
  0xfc   :  { %v911_v27 = vpop.permute.xlu1 %910  ;;  %1384 = vmatprep.subr.msk.bf16.mxu0 %vm176_vm3, %v1583_v37  ;;  %v1416_v37 = vld [vmem:[%s1813_s1 + $0x8] sm:$0x3]  ;;  %v497_v39 = vpop.permute.xlu0 %496 }
  0xfd   :  { %v912_v28 = vsel %vm157_vm2, %v909_v23, %v911_v27 }
  0xfe   :  { %1411 = vmatprep.subr.msk.bf16.mxu1 %vm176_vm3, %v912_v28 }
  0xff   :  { %925 = vmatpush1.bf16.msra.mxu1 %v919_v26 }
 0x100   :  { %1414 = vmatprep.subr.msk.bf16.mxu1 %vm176_vm3, %v1592_v45  ;;  %v499_v3 = vpop.permute.xlu1 %498  ;;  %v1127_v45 = vpop.permute.xlu0 %1126 }
 0x101   :  { %v501_v43 = vsel %vm500_vm5, %v497_v39, %v499_v3 }
 0x102   :  { %1382 = vmatmul.mubr.msk.bf16.vlgmr.msra.gmra.mrb[0].mxu0 %vm172_vm4, %v1380_v30 }
 0x103   :  { %346 = vmatpush1.bf16.msra.mxu0 %v340_v31  ;;  %377 = vmatprep.mubr.bf16.mxu0 %v1510_v8 }
 0x104   :  { %1387 = vmatprep.subr.msk.bf16.mxu0 %vm176_vm3, %v1553_v7  ;;  %v1413_v7 = vld [vmem:[%s1813_s1 + $0x6] sm:$0x3]  ;;  %v1129_v38 = vpop.permute.xlu1 %1128 }
 0x105   :  { %v1132_v41 = vsel %vm500_vm5, %v1129_v38, 0  ;;  %v1130_v48 = vsel %vm500_vm5, %v1127_v45, %v1129_v38 }
 0x106   :  { %1412 = vmatmul.mubr.msk.bf16.vlgmr.msra.gmra.mrb[0].mxu1 %vm172_vm4, %v1410_v33  ;;  %v1138_v52 = vsel %vm176_vm3, %v1130_v48, 0 }
 0x107   :  { %978 = vmatpush1.bf16.msra.mxu1 %v972_v34  ;;  %1009 = vmatprep.mubr.bf16.mxu1 %v1510_v8 }
 0x108   :  { %1417 = vmatprep.subr.msk.bf16.mxu1 %vm176_vm3, %v1551_v6  ;;  %v1025_v6 = vsel %vm176_vm3, %v1545_v2, 0  ;;  %v504_v2 = vsel %vm500_vm5, %v499_v3, 0  ;;  %v561_v42 = vpop.permute.xlu1 %560 }
 0x109   :  { %v564_v46 = vsel %vm500_vm5, %v561_v42, 0 }
 0x10c   :  { %v1188_v50 = vpop.permute.xlu1 %1187 }
 0x10d   :  { %v1191_v51 = vsel %vm500_vm5, %v1188_v50, 0 }
 0x10e   :  { %1385 = vmatmul.mubr.msk.bf16.vlgmr.msra.gmra.mrb[0].mxu0 %vm172_vm4, %v1383_v29 }
 0x10f   :  { %400 = vmatpush1.bf16.msra.mxu0 %v394_v35  ;;  %431 = vmatprep.mubr.bf16.mxu0 %v1510_v8 }
 0x110   :  { %1390 = vmatprep.subr.msk.bf16.mxu0 %vm176_vm3, %v1596_v47  ;;  %v511_v47 = vsel %vm176_vm3, %v501_v43, 0  ;;  %v621_v55 = vpop.permute.xlu1 %620 }
 0x111   :  { %v624_v60 = vsel %vm500_vm5, %v621_v55, 0 }
 0x112   :  { %1415 = vmatmul.mubr.msk.bf16.vlgmr.msra.gmra.mrb[0].mxu1 %vm172_vm4, %v1413_v7 }
 0x113   :  { %1031 = vmatpush1.bf16.msra.mxu1 %v1025_v6  ;;  %1062 = vmatprep.mubr.bf16.mxu1 %v1510_v8 }
 0x114   :  { %1420 = vmatprep.subr.msk.bf16.mxu1 %vm176_vm3, %v1606_v53  ;;  %v559_v53 = vpop.permute.xlu0 %558  ;;  %v1247_v63 = vpop.permute.xlu1 %1246 }
 0x115   :  { %v562_v54 = vsel %vm500_vm5, %v559_v53, %v561_v42  ;;  %v1250_v0 = vsel %vm500_vm5, %v1247_v63, 0 }
 0x116   :  { %v571_v57 = vsel %vm176_vm3, %v562_v54, 0 }
 0x118   :  { %v1186_v58 = vpop.permute.xlu0 %1185 }
 0x119   :  { %v1189_v59 = vsel %vm500_vm5, %v1186_v58, %v1188_v50 }
 0x11a   :  { %1388 = vmatmul.mubr.msk.bf16.vlgmr.msra.gmra.mrb[0].mxu0 %vm172_vm4, %v1386_v32  ;;  %v1197_v62 = vsel %vm176_vm3, %v1189_v59, 0 }
 0x11b   :  { %454 = vmatpush1.bf16.msra.mxu0 %v448_v36  ;;  %485 = vmatprep.mubr.bf16.mxu0 %v1510_v8 }
 0x11c   :  { %1393 = vmatprep.subr.msk.bf16.mxu0 %vm176_vm3, %v504_v2  ;;  %v619_v1 = vpop.permute.xlu0 %618 }
 0x11d   :  { %v622_v4 = vsel %vm500_vm5, %v619_v1, %v621_v55 }
 0x11e   :  { %1418 = vmatmul.mubr.msk.bf16.vlgmr.msra.gmra.mrb[0].mxu1 %vm172_vm4, %v1416_v37  ;;  %v631_v9 = vsel %vm176_vm3, %v622_v4, 0  ;;  %v1513_v37 = vmov 0.0  }
 0x11f   :  { %1084 = vmatpush1.bf16.msra.mxu1 %v1078_v40  ;;  %1115 = vmatprep.mubr.bf16.mxu1 %v1510_v8  ;;  %63 = vst.msk [vmem:[%s1815_s4] sm:$0xf] %vm62_vm7, %v1513_v37 }
 0x120   :  { %1423 = vmatprep.subr.msk.bf16.mxu1 %vm176_vm3, %v1132_v41  ;;  %v1245_v10 = vpop.permute.xlu0 %1244 }
 0x121   :  { %v1248_v11 = vsel %vm500_vm5, %v1245_v10, %v1247_v63 }
 0x122   :  { %v1256_v13 = vsel %vm176_vm3, %v1248_v11, 0 }
 0x126   :  { %1391 = vmatmul.mubr.msk.bf16.vlgmr.msra.gmra.mrb[0].mxu0 %vm172_vm4, %v1389_v44  ;;  %v1332_v43 = vld [vmem:[%s1815_s4] sm:$0xf] }
 0x127   :  { %516 = vmatpush1.bf16.msra.mxu0 %v511_v47  ;;  %547 = vmatprep.mubr.bf16.mxu0 %v1510_v8 }
 0x128   :  { %1396 = vmatprep.subr.msk.bf16.mxu0 %vm176_vm3, %v564_v46 }
 0x12a   :  { %1421 = vmatmul.mubr.msk.bf16.vlgmr.msra.gmra.mrb[0].mxu1 %vm172_vm4, %v1419_v49 }
 0x12b   :  { %1143 = vmatpush1.bf16.msra.mxu1 %v1138_v52  ;;  %1174 = vmatprep.mubr.bf16.mxu1 %v1510_v8 }
 0x12c   :  { %1426 = vmatprep.subr.msk.bf16.mxu1 %vm176_vm3, %v1191_v51 }
 0x132   :  { %1394 = vmatmul.mubr.msk.bf16.vlgmr.msra.gmra.mrb[0].mxu0 %vm172_vm4, %v1392_v56 }
 0x133   :  { %576 = vmatpush1.bf16.msra.mxu0 %v571_v57  ;;  %607 = vmatprep.mubr.bf16.mxu0 %v1510_v8 }
 0x134   :  { %1399 = vmatprep.subr.msk.bf16.mxu0 %vm176_vm3, %v624_v60 }
 0x136   :  { %1424 = vmatmul.mubr.msk.bf16.vlgmr.msra.gmra.mrb[0].mxu1 %vm172_vm4, %v1422_v61 }
 0x137   :  { %1202 = vmatpush1.bf16.msra.mxu1 %v1197_v62  ;;  %1233 = vmatprep.mubr.bf16.mxu1 %v1510_v8 }
 0x138   :  { %1429 = vmatprep.subr.msk.bf16.mxu1 %vm176_vm3, %v1250_v0 }
 0x13e   :  { %1397 = vmatmul.mubr.msk.bf16.vlgmr.msra.gmra.mrb[0].mxu0 %vm172_vm4, %v1395_v5 }
 0x13f   :  { %636 = vmatpush1.bf16.msra.mxu0 %v631_v9  ;;  %667 = vmatprep.mubr.bf16.mxu0 %v1510_v8 }
 0x142   :  { %1427 = vmatmul.mubr.msk.bf16.vlgmr.msra.gmra.mrb[0].mxu1 %vm172_vm4, %v1425_v12 }
 0x143   :  { %1261 = vmatpush1.bf16.msra.mxu1 %v1256_v13  ;;  %1292 = vmatprep.mubr.bf16.mxu1 %v1510_v8 }
 0x14a   :  { %1400 = vmatmul.mubr.msk.bf16.vlgmr.msra.gmra.mrb[0].mxu0 %vm172_vm4, %v1398_v14 }
 0x14e   :  { %1430 = vmatmul.mubr.msk.bf16.vlgmr.msra.gmra.mrb[0].mxu1 %vm172_vm4, %v1428_v15 }
 0x21d   :  { %v669_v16 = vpop.f32.mrb[0].mxu0 }
 0x21e   :  { %v698_v17 = vmul.f32 %v669_v16, %v669_v16  ;;  %v671_v18 = vpop.f32.mrb[1].mxu0  ;;  %v693_v19 = vsel %vm692_vm6, %v669_v16, 0.0 }
 0x21f   :  { %v1401_v20 = vpack.c.bf16 %v671_v18, %v669_v16  ;;  %v699_v8 = vmul.f32 %v671_v18, %v671_v18  ;;  %v673_v21 = vpop.f32.mrb[2].mxu0  ;;  %v694_v22 = vsel %vm692_vm6, %v671_v18, 0.0 }
 0x220   :  { %v674_v23 = vpop.f32.mrb[3].mxu0  ;;  %v695_v24 = vadd.f32 %v694_v22, %v693_v19  ;;  %v700_v25 = vsel %vm692_vm6, %v698_v17, 0.0 }
 0x221   :  { %1402 = vst.sshfl [vmem:[%s1814_s3] sm:$0x33 pattern:$0x76325410] %v1401_v20  ;;  %v1294_v26 = vpop.f32.mrb[0].mxu1  ;;  %v701_v27 = vsel %vm692_vm6, %v699_v8, 0.0 }
 0x222   :  { %v1323_v28 = vmul.f32 %v1294_v26, %v1294_v26  ;;  %696 = vadd.xlane.f32.xlu0 %v695_v24  ;;  %v1296_v30 = vpop.f32.mrb[1].mxu1  ;;  %v702_v31 = vadd.f32 %v701_v27, %v700_v25  ;;  %v1318_v33 = vsel %vm692_vm6, %v1294_v26, 0.0 }
 0x223   :  { %v1431_v34 = vpack.c.bf16 %v1296_v30, %v1294_v26  ;;  %v1324_v29 = vmul.f32 %v1296_v30, %v1296_v30  ;;  %v1298_v35 = vpop.f32.mrb[2].mxu1  ;;  %v1319_v7 = vsel %vm692_vm6, %v1296_v30, 0.0 }
 0x224   :  { %703 = vadd.xlane.f32.xlu1 %v702_v31  ;;  %v1299_v6 = vpop.f32.mrb[3].mxu1  ;;  %v1320_v3 = vadd.f32 %v1319_v7, %v1318_v33  ;;  %v1325_v32 = vsel %vm692_vm6, %v1323_v28, 0.0 }
 0x225   :  { %1433 = vst.sshfl [vmem:[%s1814_s3 + $0x4] sm:$0x33 pattern:$0x76325410] %v1431_v34  ;;  %v1326_v36 = vsel %vm692_vm6, %v1324_v29, 0.0 }
 0x226   :  { %1321 = vadd.xlane.f32.xlu0 %v1320_v3  ;;  %v1327_v2 = vadd.f32 %v1326_v36, %v1325_v32 }
 0x22a   :  { %1328 = vadd.xlane.f32.xlu0 %v1327_v2 }
 0x2af   :  { %v697_v38 = vpop.xlane.xlu0 %696 }
 0x2b1   :  { %v704_v40 = vpop.xlane.xlu1 %703 }
 0x2b2   :  { %v705_v42 = vsel %vm76_vm0, %v697_v38, %v704_v40 }
 0x2b3   :  { %v1322_v39 = vpop.xlane.xlu0 %1321 }
 0x2b7   :  { %v1329_v41 = vpop.xlane.xlu0 %1328 }
 0x2b8   :  { %v1330_v44 = vsel %vm76_vm0, %v1322_v39, %v1329_v41 }
 0x2b9   :  { %v1331_v45 = vadd.f32 %v1330_v44, %v705_v42 }
 0x2bb   :  { %v1333_v46 = vadd.f32 %v1332_v43, %v1331_v45 }
 0x2bd   :  { %1335 = vst.msk [vmem:[%s1815_s4] sm:$0xf] %vm62_vm7, %v1333_v46 }

// kernel: residual_forward.4
= control target key start
LH: loop header
LB: loop body
LE: loop exit
PB: predicated region body
PF: predicated region fallthrough
CT: control target
= control target key end

     0   :  { %v1574_v0 = vmov 0   ;;  %v1575_v5 = vmov 839922192   ;;  %v80_v7 = vlaneseq  ;;  %v1579_v34 = vmov 1966171168   ;;  %s1580_s10 = smov 112   ;;  %s1896_s2 = inlined_call_operand.vmem [shape: f32[4,1], index: 2, kind: input, shape index: {}]   ;;  %s1897_s1 = inlined_call_operand.vmem [shape: f32[4,1], index: 1, kind: input, shape index: {}]   ;;  %s1898_s0 = inlined_call_operand.vmem [shape: bf16[2,4,256], index: 0, kind: input, shape index: {}]   ;;  %s1899_s4 = inlined_call_operand.vmem [shape: bf16[2,256], index: 4, kind: input, shape index: {}]   ;;  %s1900_s3 = inlined_call_operand.vmem [shape: bf16[9,4,4], index: 3, kind: input, shape index: {}]   ;;  %s1901_s5 = inlined_call_operand.vmem [shape: bf16[2,4,256], index: 5, kind: output, shape index: {0}]   ;;  %s1902_s6 = inlined_call_operand.vmem [shape: f32[1,4,2], index: 6, kind: output, shape index: {1}]  }
   0x1   :  { %1573 = vset.pattern.permute.xlu1 %v1574_v0  ;;  %1572 = vset.pattern.permute.xlu0 %v1574_v0  ;;  %v86_v1 = vld [vmem:[%s1896_s2] sm:$0xf]  ;;  %v78_v6 = vunpack.c.l.s4 %v1575_v5  ;;  %v131_v35 = vunpack.c.l.s4 %v1579_v34  ;;  %vm112_vm0 = vcmask 7168   ;;  %vm164_vm1 = vcmask 1039360  }
   0x2   :  { %v72_v2 = vld [vmem:[%s1897_s1] sm:$0xf]  ;;  %89 = vperm.xlu1 %1573, %v86_v1   ;;  %250 = vmatprep.mubr.bf16.mxu0 %v1574_v0  ;;  %v81_v9 = vshrl.u32 %v80_v7, 7  ;;  %vm193_vm2 = vcmask 130048   ;;  %vm212_vm3 = vcmask 1041408   ;;  %vm208_vm4 = vcmask 31744  }
   0x3   :  { %75 = vperm.xlu0 %1572, %v72_v2   ;;  %v760_v3 = vld [vmem:[%s1896_s2] sm:$0xf]  ;;  %914 = vmatprep.mubr.bf16.mxu1 %v1574_v0  ;;  %v79_v8 = vunpack.c.0.s8 %v78_v6  ;;  %s1578_s2 = smov 16   ;;  %v132_v36 = vunpack.c.0.s8 %v131_v35  ;;  %vm536_vm5 = vcmask 916480   ;;  %vm728_vm6 = vcmask 1043456  }
   0x4   :  { %v746_v4 = vld [vmem:[%s1897_s1] sm:$0xf]  ;;  %s1577_s1 = smov 127   ;;  %v149_v42 = vsub.s32 0, %v81_v9  ;;  %vm68_vm7 = vcmask 11264  }
   0x5   :  { %v70_v10 = vld [vmem:[%s1898_s0] sm:$0xff]   ;;  %v82_v11 = vsub.s32 %v79_v8, %v81_v9  ;;  %s1576_s0 = smov 1   ;;  %v135_v38 = vsub.s32 %v132_v36, %v81_v9 }
   0x6   :  { %763 = vperm.xlu1 %1573, %v760_v3   ;;  %v71_v12 = vunpack.c.l.bf16 %v70_v10  ;;  %v745_v18 = vunpack.c.h.bf16 %v70_v10  ;;  %v1440_v37 = vld.sshfl [vmem:[%s1899_s4] sm:$0x11 pattern:$0x75316420] }
   0x7   :  { %749 = vperm.xlu0 %1572, %v746_v4   ;;  %v129_v39 = vcombine.high %v1440_v37, %v1440_v37  ;;  %v136_v40 = vrot.slane %v1440_v37, %v135_v38  ;;  %v198_v37 = vld [vmem:[%s1900_s3] sm:$0x3] }
   0x9   :  { %v143_v41 = vrot.slane %v129_v39, %v135_v38  ;;  %v145_v43 = vpack.i.b16 %v136_v40, %v136_v40  ;;  %v171_v48 = vshrl.u32 %v136_v40, 16 }
   0xb   :  { %v152_v44 = vpack.i.b16 %v143_v41, %v143_v41  ;;  %v150_v45 = vrot.slane %v145_v43, %v149_v42  ;;  %v178_v49 = vshrl.u32 %v143_v41, 16  ;;  %v172_v56 = vpack.i.b16 %v171_v48, %v171_v48  ;;  %v865_v41 = vld [vmem:[%s1900_s3] sm:$0x3] }
   0xd   :  { %v157_v47 = vrot.slane %v152_v44, %v149_v42  ;;  %v179_v57 = vpack.i.b16 %v178_v49, %v178_v49  ;;  %v177_v1 = vrot.slane %v172_v56, %v149_v42 }
   0xf   :  { %v184_v2 = vrot.slane %v179_v57, %v149_v42  ;;  %v1479_v57 = vld [vmem:[%s1900_s3 + $0x6] sm:$0x3] }
  0x81   :  { %v90_v13 = vpop.permute.xlu1 %89 }
  0x82   :  { %v76_v14 = vpop.permute.xlu0 %75  ;;  %v97_v15 = vrot.slane %v90_v13, %v82_v11 }
  0x83   :  { %v83_v16 = vrot.slane %v76_v14, %v82_v11 }
  0x85   :  { %v85_v17 = vmul.f32 %v83_v16, %v71_v12  ;;  %v764_v19 = vpop.permute.xlu1 %763 }
  0x86   :  { %v750_v20 = vpop.permute.xlu0 %749  ;;  %v771_v24 = vrot.slane %v764_v19, %v82_v11 }
  0x87   :  { %v99_v21 = vadd.f32 %v97_v15, %v85_v17  ;;  %v757_v22 = vrot.slane %v750_v20, %v82_v11 }
  0x89   :  { %v100_v23 = vmax.f32 %v99_v21, 0.0  ;;  %v759_v25 = vmul.f32 %v757_v22, %v745_v18  ;;  %v1441_v21 = vld [vmem:[%s1900_s3 + $0x2] sm:$0x3] }
  0x8b   :  { %v102_v26 = vcombine.high %v100_v23, %v100_v23  ;;  %v1636_v27 = vpack.c.bf16 %v100_v23, %v100_v23  ;;  %v773_v28 = vadd.f32 %v771_v24, %v759_v25  ;;  %v1471_v25 = vld [vmem:[%s1900_s3 + $0x2] sm:$0x3] }
  0x8d   :  { %v1638_v29 = vpack.c.bf16 %v102_v26, %v102_v26  ;;  %v774_v30 = vmax.f32 %v773_v28, 0.0  ;;  %108 = vrot.lane.b32.xlu0 %v1636_v27, %s1576_s0 }
  0x8f   :  { %v776_v31 = vcombine.high %v774_v30, %v774_v30  ;;  %v1641_v32 = vpack.c.bf16 %v774_v30, %v774_v30  ;;  %110 = vrot.lane.b32.xlu1 %v1638_v29, %s1576_s0 }
  0x91   :  { %v1644_v33 = vpack.c.bf16 %v776_v31, %v776_v31  ;;  %782 = vrot.lane.b32.xlu0 %v1641_v32, %s1576_s0 }
  0x93   :  { %784 = vrot.lane.b32.xlu1 %v1644_v33, %s1576_s0 }
  0x95   :  { %160 = vrot.lane.b32.xlu0 %v1636_v27, %s1577_s1 }
  0x97   :  { %162 = vrot.lane.b32.xlu1 %v1638_v29, %s1577_s1 }
  0x99   :  { %831 = vrot.lane.b32.xlu0 %v1641_v32, %s1577_s1 }
  0x9b   :  { %833 = vrot.lane.b32.xlu1 %v1644_v33, %s1577_s1 }
  0x9d   :  { %199 = vrot.lane.b32.xlu0 %v1636_v27, %s1578_s2 }
  0x9f   :  { %201 = vrot.lane.b32.xlu1 %v1638_v29, %s1578_s2 }
  0xa1   :  { %866 = vrot.lane.b32.xlu0 %v1641_v32, %s1578_s2 }
  0xa3   :  { %868 = vrot.lane.b32.xlu1 %v1644_v33, %s1578_s2 }
  0xff   :  { %v109_v46 = vpop.permute.xlu0 %108 }
 0x100   :  { %v118_v50 = vsel %vm112_vm0, 0, %v109_v46 }
 0x101   :  { %v1664_v51 = vmul.bf16 %v150_v45, %v118_v50  ;;  %v111_v52 = vpop.permute.xlu1 %110 }
 0x102   :  { %v113_v53 = vsel %vm112_vm0, %v109_v46, %v111_v52 }
 0x103   :  { %v1667_v54 = vmul.bf16 %v157_v47, %v113_v53  ;;  %189 = vrot.lane.b32.xlu0 %v1664_v51, %s1578_s2  ;;  %v783_v55 = vpop.permute.xlu0 %782  ;;  %v1446_v53 = vld [vmem:[%s1900_s3 + $0x4] sm:$0x3] }
 0x104   :  { %v789_v58 = vsel %vm112_vm0, 0, %v783_v55 }
 0x105   :  { %v1672_v59 = vmul.bf16 %v789_v58, %v150_v45  ;;  %191 = vrot.lane.b32.xlu1 %v1667_v54, %s1578_s2  ;;  %v785_v60 = vpop.permute.xlu1 %784  ;;  %v1452_v58 = vld [vmem:[%s1900_s3 + $0x8] sm:$0x3] }
 0x106   :  { %v786_v61 = vsel %vm112_vm0, %v783_v55, %v785_v60  ;;  %v1476_v55 = vld [vmem:[%s1900_s3 + $0x4] sm:$0x3] }
 0x107   :  { %v1677_v62 = vmul.bf16 %v786_v61, %v157_v47  ;;  %858 = vrot.lane.b32.xlu0 %v1672_v59, %s1578_s2  ;;  %v161_v63 = vpop.permute.xlu0 %160  ;;  %v1038_v56 = vsel %vm212_vm3, %v1672_v59, 0 }
 0x109   :  { %860 = vrot.lane.b32.xlu1 %v1677_v62, %s1578_s2  ;;  %v163_v3 = vpop.permute.xlu1 %162 }
 0x10a   :  { %v165_v4 = vsel %vm164_vm1, %v161_v63, %v163_v3  ;;  %v169_v5 = vsel %vm164_vm1, %v163_v3, 0 }
 0x10b   :  { %v1683_v6 = vmul.bf16 %v177_v1, %v165_v4  ;;  %v1685_v7 = vmul.bf16 %v184_v2, %v169_v5  ;;  %v832_v8 = vpop.permute.xlu0 %831  ;;  %v1455_v4 = vld [vmem:[%s1900_s3 + $0xa] sm:$0x3] }
 0x10d   :  { %312 = vrot.lane.b32.xlu1 %v1685_v7, %s1578_s2  ;;  %310 = vrot.lane.b32.xlu0 %v1683_v6, %s1578_s2  ;;  %v834_v9 = vpop.permute.xlu1 %833 }
 0x10e   :  { %v835_v10 = vsel %vm164_vm1, %v832_v8, %v834_v9  ;;  %v838_v11 = vsel %vm164_vm1, %v834_v9, 0  ;;  %v1485_v9 = vld [vmem:[%s1900_s3 + $0xa] sm:$0x3] }
 0x10f   :  { %v1691_v12 = vmul.bf16 %v835_v10, %v177_v1  ;;  %v1693_v13 = vmul.bf16 %v838_v11, %v184_v2  ;;  %v200_v14 = vpop.permute.xlu0 %199 }
 0x110   :  { %v205_v15 = vsel %vm193_vm2, 0, %v200_v14 }
 0x111   :  { %976 = vrot.lane.b32.xlu1 %v1693_v13, %s1578_s2  ;;  %974 = vrot.lane.b32.xlu0 %v1691_v12, %s1578_s2  ;;  %v202_v16 = vpop.permute.xlu1 %201  ;;  %v213_v19 = vsel %vm212_vm3, %v205_v15, 0  ;;  %v1144_v63 = vsel %vm212_vm3, %v1691_v12, 0 }
 0x112   :  { %v203_v17 = vsel %vm193_vm2, %v200_v14, %v202_v16  ;;  %v1458_v16 = vld [vmem:[%s1900_s3 + $0xc] sm:$0x3] }
 0x113   :  { %v867_v18 = vpop.permute.xlu0 %866  ;;  %1442 = vmatprep.subr.msk.bf16.mxu0 %vm212_vm3, %v203_v17 }
 0x114   :  { %219 = vmatpush1.bf16.msra.mxu0 %v213_v19  ;;  %v872_v20 = vsel %vm193_vm2, 0, %v867_v18 }
 0x115   :  { %534 = vrot.lane.b32.xlu1 %v1667_v54, %s1580_s10  ;;  %532 = vrot.lane.b32.xlu0 %v1664_v51, %s1580_s10  ;;  %v869_v22 = vpop.permute.xlu1 %868  ;;  %v877_v24 = vsel %vm212_vm3, %v872_v20, 0 }
 0x116   :  { %v870_v23 = vsel %vm193_vm2, %v867_v18, %v869_v22 }
 0x117   :  { %1472 = vmatprep.subr.msk.bf16.mxu1 %vm212_vm3, %v870_v23  ;;  %1443 = vmatmul.mubr.msk.bf16.vlgmr.msra.gmra.mrb[0].mxu0 %vm208_vm4, %v1441_v21  ;;  %v1488_v21 = vld [vmem:[%s1900_s3 + $0xc] sm:$0x3] }
 0x118   :  { %883 = vmatpush1.bf16.msra.mxu1 %v877_v24  ;;  %299 = vmatprep.mubr.bf16.mxu0 %v1574_v0 }
 0x119   :  { %1194 = vrot.lane.b32.xlu1 %v1677_v62, %s1580_s10  ;;  %1192 = vrot.lane.b32.xlu0 %v1672_v59, %s1580_s10  ;;  %v484_v59 = vsel %vm212_vm3, %v1683_v6, 0 }
 0x11b   :  { %1473 = vmatmul.mubr.msk.bf16.vlgmr.msra.gmra.mrb[0].mxu1 %vm208_vm4, %v1471_v25 }
 0x11c   :  { %963 = vmatprep.mubr.bf16.mxu1 %v1574_v0 }
 0x11d   :  { %596 = vrot.lane.b32.xlu1 %v1638_v29, %s1580_s10  ;;  %594 = vrot.lane.b32.xlu0 %v1636_v27, %s1580_s10 }
 0x121   :  { %1253 = vrot.lane.b32.xlu1 %v1644_v33, %s1580_s10  ;;  %1251 = vrot.lane.b32.xlu0 %v1641_v32, %s1580_s10 }
 0x125   :  { %656 = vrot.lane.b32.xlu1 %v1685_v7, %s1580_s10  ;;  %654 = vrot.lane.b32.xlu0 %v1683_v6, %s1580_s10 }
 0x129   :  { %1312 = vrot.lane.b32.xlu1 %v1693_v13, %s1580_s10  ;;  %1310 = vrot.lane.b32.xlu0 %v1691_v12, %s1580_s10 }
 0x175   :  { %v190_v26 = vpop.permute.xlu0 %189 }
 0x176   :  { %v197_v28 = vsel %vm193_vm2, 0, %v190_v26 }
 0x177   :  { %v192_v30 = vpop.permute.xlu1 %191  ;;  %v262_v34 = vsel %vm212_vm3, %v197_v28, 0  ;;  %v1461_v28 = vld [vmem:[%s1900_s3 + $0xe] sm:$0x3] }
 0x178   :  { %v194_v31 = vsel %vm193_vm2, %v190_v26, %v192_v30 }
 0x179   :  { %v859_v35 = vpop.permute.xlu0 %858  ;;  %1444 = vmatprep.subr.msk.bf16.mxu0 %vm212_vm3, %v194_v31 }
 0x17a   :  { %v864_v36 = vsel %vm193_vm2, 0, %v859_v35  ;;  %268 = vmatpush1.bf16.msra.mxu0 %v262_v34 }
 0x17b   :  { %v861_v38 = vpop.permute.xlu1 %860  ;;  %v926_v40 = vsel %vm212_vm3, %v864_v36, 0 }
 0x17c   :  { %v862_v39 = vsel %vm193_vm2, %v859_v35, %v861_v38  ;;  %v1491_v35 = vld [vmem:[%s1900_s3 + $0xe] sm:$0x3]  ;;  %v1494_v38 = vld [vmem:[%s1900_s3 + $0x10] sm:$0x3] }
 0x17d   :  { %1445 = vmatmul.mubr.msk.bf16.vlgmr.msra.gmra.mrb[0].mxu0 %vm208_vm4, %v198_v37  ;;  %1474 = vmatprep.subr.msk.bf16.mxu1 %vm212_vm3, %v862_v39  ;;  %v1464_v37 = vld [vmem:[%s1900_s3 + $0x10] sm:$0x3] }
 0x17e   :  { %932 = vmatpush1.bf16.msra.mxu1 %v926_v40  ;;  %359 = vmatprep.mubr.bf16.mxu0 %v1574_v0 }
 0x17f   :  { %v311_v42 = vpop.permute.xlu0 %310  ;;  %v313_v43 = vpop.permute.xlu1 %312 }
 0x180   :  { %v316_v44 = vsel %vm193_vm2, 0, %v311_v42  ;;  %v314_v45 = vsel %vm193_vm2, %v311_v42, %v313_v43 }
 0x181   :  { %v322_v46 = vsel %vm212_vm3, %v316_v44, 0  ;;  %1447 = vmatprep.subr.msk.bf16.mxu0 %vm212_vm3, %v314_v45  ;;  %1475 = vmatmul.mubr.msk.bf16.vlgmr.msra.gmra.mrb[0].mxu1 %vm208_vm4, %v865_v41 }
 0x182   :  { %328 = vmatpush1.bf16.msra.mxu0 %v322_v46  ;;  %1022 = vmatprep.mubr.bf16.mxu1 %v1574_v0 }
 0x183   :  { %v975_v47 = vpop.permute.xlu0 %974  ;;  %1450 = vmatprep.subr.msk.bf16.mxu0 %vm212_vm3, %v1667_v54  ;;  %v977_v48 = vpop.permute.xlu1 %976  ;;  %v376_v54 = vsel %vm212_vm3, %v1664_v51, 0  ;;  %v1449_v51 = vld [vmem:[%s1900_s3 + $0x6] sm:$0x3] }
 0x184   :  { %v980_v49 = vsel %vm193_vm2, 0, %v975_v47  ;;  %v978_v50 = vsel %vm193_vm2, %v975_v47, %v977_v48 }
 0x185   :  { %v985_v52 = vsel %vm212_vm3, %v980_v49, 0  ;;  %1477 = vmatprep.subr.msk.bf16.mxu1 %vm212_vm3, %v978_v50 }
 0x186   :  { %991 = vmatpush1.bf16.msra.mxu1 %v985_v52 }
 0x187   :  { %1480 = vmatprep.subr.msk.bf16.mxu1 %vm212_vm3, %v1677_v62  ;;  %v533_v62 = vpop.permute.xlu0 %532 }
 0x189   :  { %1448 = vmatmul.mubr.msk.bf16.vlgmr.msra.gmra.mrb[0].mxu0 %vm208_vm4, %v1446_v53 }
 0x18a   :  { %382 = vmatpush1.bf16.msra.mxu0 %v376_v54  ;;  %413 = vmatprep.mubr.bf16.mxu0 %v1574_v0 }
 0x18b   :  { %1453 = vmatprep.subr.msk.bf16.mxu0 %vm212_vm3, %v1638_v29  ;;  %v430_v29 = vsel %vm212_vm3, %v1636_v27, 0  ;;  %v535_v27 = vpop.permute.xlu1 %534  ;;  %v1193_v5 = vpop.permute.xlu0 %1192 }
 0x18c   :  { %v540_v60 = vsel %vm536_vm5, %v535_v27, 0  ;;  %v537_v3 = vsel %vm536_vm5, %v533_v62, %v535_v27 }
 0x18d   :  { %1478 = vmatmul.mubr.msk.bf16.vlgmr.msra.gmra.mrb[0].mxu1 %vm208_vm4, %v1476_v55  ;;  %v547_v6 = vsel %vm212_vm3, %v537_v3, 0 }
 0x18e   :  { %1044 = vmatpush1.bf16.msra.mxu1 %v1038_v56  ;;  %1075 = vmatprep.mubr.bf16.mxu1 %v1574_v0 }
 0x18f   :  { %1483 = vmatprep.subr.msk.bf16.mxu1 %vm212_vm3, %v1644_v33  ;;  %v1091_v33 = vsel %vm212_vm3, %v1641_v32, 0  ;;  %v1482_v32 = vld [vmem:[%s1900_s3 + $0x8] sm:$0x3]  ;;  %v1195_v61 = vpop.permute.xlu1 %1194  ;;  %v595_v12 = vpop.permute.xlu0 %594 }
 0x190   :  { %v1198_v1 = vsel %vm536_vm5, %v1195_v61, 0 }
 0x193   :  { %v597_v2 = vpop.permute.xlu1 %596  ;;  %v1252_v17 = vpop.permute.xlu0 %1251 }
 0x194   :  { %v600_v8 = vsel %vm536_vm5, %v597_v2, 0  ;;  %v598_v15 = vsel %vm536_vm5, %v595_v12, %v597_v2 }
 0x195   :  { %1451 = vmatmul.mubr.msk.bf16.vlgmr.msra.gmra.mrb[0].mxu0 %vm208_vm4, %v1449_v51  ;;  %v607_v18 = vsel %vm212_vm3, %v598_v15, 0 }
 0x196   :  { %436 = vmatpush1.bf16.msra.mxu0 %v430_v29  ;;  %467 = vmatprep.mubr.bf16.mxu0 %v1574_v0 }
 0x197   :  { %1456 = vmatprep.subr.msk.bf16.mxu0 %vm212_vm3, %v1685_v7  ;;  %v1196_v7 = vsel %vm536_vm5, %v1193_v5, %v1195_v61  ;;  %v1254_v10 = vpop.permute.xlu1 %1253  ;;  %v655_v24 = vpop.permute.xlu0 %654 }
 0x198   :  { %v1204_v11 = vsel %vm212_vm3, %v1196_v7, 0  ;;  %v1255_v19 = vsel %vm536_vm5, %v1252_v17, %v1254_v10 }
 0x199   :  { %1481 = vmatmul.mubr.msk.bf16.vlgmr.msra.gmra.mrb[0].mxu1 %vm208_vm4, %v1479_v57  ;;  %v1263_v23 = vsel %vm212_vm3, %v1255_v19, 0 }
 0x19a   :  { %1097 = vmatpush1.bf16.msra.mxu1 %v1091_v33  ;;  %1128 = vmatprep.mubr.bf16.mxu1 %v1574_v0 }
 0x19b   :  { %1486 = vmatprep.subr.msk.bf16.mxu1 %vm212_vm3, %v1693_v13  ;;  %v1257_v13 = vsel %vm536_vm5, %v1254_v10, 0  ;;  %v657_v14 = vpop.permute.xlu1 %656  ;;  %v1311_v30 = vpop.permute.xlu0 %1310 }
 0x19c   :  { %v660_v20 = vsel %vm536_vm5, %v657_v14, 0  ;;  %v658_v26 = vsel %vm536_vm5, %v655_v24, %v657_v14 }
 0x19d   :  { %v667_v31 = vsel %vm212_vm3, %v658_v26, 0 }
 0x19f   :  { %v1313_v22 = vpop.permute.xlu1 %1312 }
 0x1a0   :  { %v1316_v25 = vsel %vm536_vm5, %v1313_v22, 0  ;;  %v1314_v34 = vsel %vm536_vm5, %v1311_v30, %v1313_v22 }
 0x1a1   :  { %1454 = vmatmul.mubr.msk.bf16.vlgmr.msra.gmra.mrb[0].mxu0 %vm208_vm4, %v1452_v58  ;;  %v1322_v36 = vsel %vm212_vm3, %v1314_v34, 0 }
 0x1a2   :  { %490 = vmatpush1.bf16.msra.mxu0 %v484_v59  ;;  %521 = vmatprep.mubr.bf16.mxu0 %v1574_v0 }
 0x1a3   :  { %1459 = vmatprep.subr.msk.bf16.mxu0 %vm212_vm3, %v540_v60 }
 0x1a5   :  { %1484 = vmatmul.mubr.msk.bf16.vlgmr.msra.gmra.mrb[0].mxu1 %vm208_vm4, %v1482_v32  ;;  %v1581_v32 = vmov 0.0  }
 0x1a6   :  { %1150 = vmatpush1.bf16.msra.mxu1 %v1144_v63  ;;  %1181 = vmatprep.mubr.bf16.mxu1 %v1574_v0  ;;  %69 = vst.msk [vmem:[%s1902_s6] sm:$0xf] %vm68_vm7, %v1581_v32 }
 0x1a7   :  { %1489 = vmatprep.subr.msk.bf16.mxu1 %vm212_vm3, %v1198_v1 }
 0x1ad   :  { %1457 = vmatmul.mubr.msk.bf16.vlgmr.msra.gmra.mrb[0].mxu0 %vm208_vm4, %v1455_v4  ;;  %v1398_v3 = vld [vmem:[%s1902_s6] sm:$0xf] }
 0x1ae   :  { %552 = vmatpush1.bf16.msra.mxu0 %v547_v6  ;;  %583 = vmatprep.mubr.bf16.mxu0 %v1574_v0 }
 0x1af   :  { %1462 = vmatprep.subr.msk.bf16.mxu0 %vm212_vm3, %v600_v8 }
 0x1b1   :  { %1487 = vmatmul.mubr.msk.bf16.vlgmr.msra.gmra.mrb[0].mxu1 %vm208_vm4, %v1485_v9 }
 0x1b2   :  { %1209 = vmatpush1.bf16.msra.mxu1 %v1204_v11  ;;  %1240 = vmatprep.mubr.bf16.mxu1 %v1574_v0 }
 0x1b3   :  { %1492 = vmatprep.subr.msk.bf16.mxu1 %vm212_vm3, %v1257_v13 }
 0x1b9   :  { %1460 = vmatmul.mubr.msk.bf16.vlgmr.msra.gmra.mrb[0].mxu0 %vm208_vm4, %v1458_v16 }
 0x1ba   :  { %612 = vmatpush1.bf16.msra.mxu0 %v607_v18  ;;  %643 = vmatprep.mubr.bf16.mxu0 %v1574_v0 }
 0x1bb   :  { %1465 = vmatprep.subr.msk.bf16.mxu0 %vm212_vm3, %v660_v20 }
 0x1bd   :  { %1490 = vmatmul.mubr.msk.bf16.vlgmr.msra.gmra.mrb[0].mxu1 %vm208_vm4, %v1488_v21 }
 0x1be   :  { %1268 = vmatpush1.bf16.msra.mxu1 %v1263_v23  ;;  %1299 = vmatprep.mubr.bf16.mxu1 %v1574_v0 }
 0x1bf   :  { %1495 = vmatprep.subr.msk.bf16.mxu1 %vm212_vm3, %v1316_v25 }
 0x1c5   :  { %1463 = vmatmul.mubr.msk.bf16.vlgmr.msra.gmra.mrb[0].mxu0 %vm208_vm4, %v1461_v28 }
 0x1c6   :  { %672 = vmatpush1.bf16.msra.mxu0 %v667_v31  ;;  %703 = vmatprep.mubr.bf16.mxu0 %v1574_v0 }
 0x1c9   :  { %1493 = vmatmul.mubr.msk.bf16.vlgmr.msra.gmra.mrb[0].mxu1 %vm208_vm4, %v1491_v35 }
 0x1ca   :  { %1327 = vmatpush1.bf16.msra.mxu1 %v1322_v36  ;;  %1358 = vmatprep.mubr.bf16.mxu1 %v1574_v0 }
 0x1d1   :  { %1466 = vmatmul.mubr.msk.bf16.vlgmr.msra.gmra.mrb[0].mxu0 %vm208_vm4, %v1464_v37 }
 0x1d5   :  { %1496 = vmatmul.mubr.msk.bf16.vlgmr.msra.gmra.mrb[0].mxu1 %vm208_vm4, %v1494_v38 }
 0x2a4   :  { %v705_v39 = vpop.f32.mrb[0].mxu0 }
 0x2a5   :  { %v734_v40 = vmul.f32 %v705_v39, %v705_v39  ;;  %v707_v41 = vpop.f32.mrb[1].mxu0  ;;  %v729_v42 = vsel %vm728_vm6, %v705_v39, 0.0 }
 0x2a6   :  { %v1467_v43 = vpack.c.bf16 %v707_v41, %v705_v39  ;;  %v735_v0 = vmul.f32 %v707_v41, %v707_v41  ;;  %v709_v44 = vpop.f32.mrb[2].mxu0  ;;  %v730_v45 = vsel %vm728_vm6, %v707_v41, 0.0 }
 0x2a7   :  { %v710_v46 = vpop.f32.mrb[3].mxu0  ;;  %v731_v47 = vadd.f32 %v730_v45, %v729_v42  ;;  %v736_v48 = vsel %vm728_vm6, %v734_v40, 0.0 }
 0x2a8   :  { %1468 = vst.sshfl [vmem:[%s1901_s5] sm:$0x33 pattern:$0x76325410] %v1467_v43  ;;  %v1360_v49 = vpop.f32.mrb[0].mxu1  ;;  %v737_v50 = vsel %vm728_vm6, %v735_v0, 0.0 }
 0x2a9   :  { %v1389_v52 = vmul.f32 %v1360_v49, %v1360_v49  ;;  %732 = vadd.xlane.f32.xlu0 %v731_v47  ;;  %v1362_v53 = vpop.f32.mrb[1].mxu1  ;;  %v738_v54 = vadd.f32 %v737_v50, %v736_v48  ;;  %v1384_v55 = vsel %vm728_vm6, %v1360_v49, 0.0 }
 0x2aa   :  { %v1497_v56 = vpack.c.bf16 %v1362_v53, %v1360_v49  ;;  %v1390_v51 = vmul.f32 %v1362_v53, %v1362_v53  ;;  %v1364_v29 = vpop.f32.mrb[2].mxu1  ;;  %v1385_v57 = vsel %vm728_vm6, %v1362_v53, 0.0 }
 0x2ab   :  { %739 = vadd.xlane.f32.xlu1 %v738_v54  ;;  %v1365_v33 = vpop.f32.mrb[3].mxu1  ;;  %v1386_v27 = vadd.f32 %v1385_v57, %v1384_v55  ;;  %v1391_v58 = vsel %vm728_vm6, %v1389_v52, 0.0 }
 0x2ac   :  { %1499 = vst.sshfl [vmem:[%s1901_s5 + $0x4] sm:$0x33 pattern:$0x76325410] %v1497_v56  ;;  %v1392_v59 = vsel %vm728_vm6, %v1390_v51, 0.0 }
 0x2ad   :  { %1387 = vadd.xlane.f32.xlu0 %v1386_v27  ;;  %v1393_v60 = vadd.f32 %v1392_v59, %v1391_v58 }
 0x2b1   :  { %1394 = vadd.xlane.f32.xlu0 %v1393_v60 }
 0x336   :  { %v733_v61 = vpop.xlane.xlu0 %732 }
 0x338   :  { %v740_v63 = vpop.xlane.xlu1 %739 }
 0x339   :  { %v741_v2 = vsel %vm112_vm0, %v733_v61, %v740_v63 }
 0x33a   :  { %v1388_v62 = vpop.xlane.xlu0 %1387 }
 0x33e   :  { %v1395_v1 = vpop.xlane.xlu0 %1394 }
 0x33f   :  { %v1396_v4 = vsel %vm112_vm0, %v1388_v62, %v1395_v1 }
 0x340   :  { %v1397_v5 = vadd.f32 %v1396_v4, %v741_v2 }
 0x342   :  { %v1399_v6 = vadd.f32 %v1398_v3, %v1397_v5 }
 0x344   :  { %1401 = vst.msk [vmem:[%s1902_s6] sm:$0xf] %vm68_vm7, %v1399_v6 }

</bundles_post_ra>
